<compile_context>
chip_gen: v7x
topology: tpu7x:2x2x1
jax: 0.10.0
libtpu: 0.0.40
codegen_flags: <defaults>
</compile_context>

<pallas_src>
import jax
import jax.numpy as jnp
from jax import lax
from jax.experimental import pallas as pl
from jax.experimental.pallas import tpu as pltpu

DECAY = 0.99
EPS = 1e-5

NUM_CORES = 2                      # leading "parallel" grid axis (v7x has 2 TCs)
_LANE, _SUB = 128, 8
_VMEM_CAP = 48 * 1024 * 1024       # stay well under v7x's 64 MiB physical VMEM
_VMEM_FLOOR = 16 * 1024 * 1024     # safety floor for tiny demo-sized problems


def _round_up(v, m):
    return (v + m - 1) // m * m


def _vmem_estimate(tile_n, d, k):
    """Rough per-step VMEM working-set estimate in bytes (lane/sublane padded)."""
    d_lane = _round_up(d, _LANE)
    k_lane = _round_up(k, _LANE)
    d_sub = _round_up(d, _SUB)
    elems = (
        2 * tile_n * d_lane        # x tiles, double-buffered, lane-padded
        + 2 * tile_n * d_lane      # q tiles, double-buffered
        + 2 * _SUB * tile_n        # lane-dense id tiles, double-buffered
        + 6 * tile_n * k_lane      # (TILE_N, K) score / one-hot / iota temporaries
        + 2 * tile_n * d_lane      # (TILE_N, D) temporaries (bf16 x, x^2, q live)
        + 6 * d_sub * k_lane       # codebooks (f32 + bf16) + emd_sum accumulator
        + 8 * _SUB * k_lane        # e_sq, one_sum, diff blocks + slack
    )
    return 4 * elems


def _vmem_limit_bytes(tile_n, d, k):
    # ~1.5x the working set, capped below v7x's 64 MiB; small floor for safety.
    est = _vmem_estimate(tile_n, d, k)
    return int(min(_VMEM_CAP, max(int(1.5 * est), _VMEM_FLOOR)))


def _make_kernel(n_valid, tile_n, tiles_per_core, k, needs_mask):
    def kernel(x_ref, e2_ref, e_ref, esq_ref,
               q_ref, id_ref, diff_ref, onesum_ref, emdsum_ref):
        c = pl.program_id(0)       # core (parallel) axis
        t = pl.program_id(1)       # per-core tile (arbitrary, carries accumulators)

        # Initialize this core's partial accumulators on its first tile.
        @pl.when(t == 0)
        def _init():
            diff_ref[...] = jnp.zeros_like(diff_ref)
            onesum_ref[...] = jnp.zeros_like(onesum_ref)
            emdsum_ref[...] = jnp.zeros_like(emdsum_ref)

        x = x_ref[...]             # (TILE_N, D) f32
        e = e_ref[...]             # (D, K)      f32   exact codebook (for q / emd_sum)
        e2_bf = e2_ref[...]        # (D, K)      bf16  2*codebook (for the distance matmul)
        e_sq = esq_ref[...]        # (1, K)      f32   |e_k|^2, exact

        # argmin_k ||x - e_k||^2  ==  argmax_k (2*x.e_k - |e_k|^2)
        # Distance matmul on the MXU bf16 path (f32 accumulation); the 2x scale
        # is folded into e2_bf in the wrapper so only one VPU subtract remains.
        x_bf = x.astype(jnp.bfloat16)
        neg = jnp.dot(x_bf, e2_bf, preferred_element_type=jnp.float32) - e_sq

        row_max = jnp.max(neg, axis=1, keepdims=True)                 # (TILE_N, 1)
        col_iota = lax.broadcasted_iota(jnp.int32, (tile_n, k), 1)
        ids = jnp.min(jnp.where(neg == row_max, col_iota, k),
                      axis=1, keepdims=True)                          # first occurrence
        onehot = (col_iota == ids).astype(jnp.float32)                # (TILE_N, K)

        # Lane-dense (1, TILE_N) id slab via a tiny exact matmul (one-hot times
        # small integers) instead of a sublane->lane relayout of `ids`.
        k_row = lax.broadcasted_iota(jnp.int32, (1, k), 1).astype(jnp.float32)
        ids_row = lax.dot_general(k_row, onehot, (((1,), (1,)), ((), ())),
                                  preferred_element_type=jnp.float32)
        id_ref[...] = ids_row.astype(jnp.int32)                       # (1, TILE_N)

        if needs_mask:
            # Zero padded rows so they contribute nothing to q / diff / EMA stats.
            row_iota = lax.broadcasted_iota(jnp.int32, (tile_n, 1), 0)
            base = (c * tiles_per_core + t) * tile_n
            valid = (base + row_iota) < n_valid
            onehot = onehot * valid.astype(jnp.float32)
            row_max = jnp.where(valid, row_max, 0.0)

        # Exact f32 code gather: q = onehot @ embed.T == F.embedding(emd_id, embed.T)
        q = lax.dot_general(onehot, e, (((1,), (1,)), ((), ())),
                            preferred_element_type=jnp.float32)       # (TILE_N, D)
        q_ref[...] = q   # forward value of x + (q - x).detach() is just q

        # sum ||q - x||^2 == sum ||x||^2 - sum row_max   (padded rows masked above)
        diff_ref[...] += jnp.sum(x * x) - jnp.sum(row_max)

        onesum_ref[...] += jnp.sum(onehot, axis=0, keepdims=True)     # (1, K)
        emdsum_ref[...] += lax.dot_general(
            x, onehot, (((0,), (0,)), ((), ())),
            preferred_element_type=jnp.float32)                       # (D, K)

    return kernel


def quantizer_forward(x, embed, cluster_size, emd_avg, *, tile_n=4096):
    """VQ-VAE Quantizer forward.

    x: (..., emd_dim) array (channels-last).  embed: (emd_dim, nb_emd).
    Returns (q, diff, emd_id, (new_cluster_size, new_emd_avg, new_embed)).
    """
    emd_dim, nb_emd = embed.shape
    lead_shape = x.shape[:-1]

    flatten = x.reshape(-1, emd_dim).astype(jnp.float32)
    n = flatten.shape[0]

    # Tile sizing: as big as possible (amortize per-step pipeline overhead),
    # shrunk (a) to fit the scoped-VMEM budget and (b) to the data when N is small.
    tile_n = _round_up(max(tile_n, 128), 128)
    while tile_n > 256 and int(1.5 * _vmem_estimate(tile_n, emd_dim, nb_emd)) > _VMEM_CAP:
        tile_n = _round_up(tile_n // 2, 128)
    tile_n = min(tile_n, _round_up(pl.cdiv(n, NUM_CORES), 128))

    tiles_per_core = pl.cdiv(n, NUM_CORES * tile_n)
    n_pad = NUM_CORES * tiles_per_core * tile_n
    needs_mask = n_pad != n
    if needs_mask:
        flatten = jnp.pad(flatten, ((0, n_pad - n), (0, 0)))

    embed_f = embed.astype(jnp.float32)
    e2_bf = (2.0 * embed_f).astype(jnp.bfloat16)              # (D, K) for distance matmul
    e_sq = jnp.sum(embed_f * embed_f, axis=0, keepdims=True)  # (1, K), exact f32

    kernel = _make_kernel(n, tile_n, tiles_per_core, nb_emd, needs_mask)
    tpc = tiles_per_core

    out_shape = (
        jax.ShapeDtypeStruct((n_pad, emd_dim), jnp.float32),          # q (flat, padded)
        jax.ShapeDtypeStruct((1, n_pad), jnp.int32),                  # emd_id (lane-dense)
        jax.ShapeDtypeStruct((NUM_CORES, 1, 1), jnp.float32),         # per-core sum((q-x)^2)
        jax.ShapeDtypeStruct((NUM_CORES, 1, nb_emd), jnp.float32),    # per-core sum(onehot)
        jax.ShapeDtypeStruct((NUM_CORES, emd_dim, nb_emd), jnp.float32),  # per-core x^T@onehot
    )

    q_pad, ids_row, diff_parts, one_parts, emd_parts = pl.pallas_call(
        kernel,
        out_shape=out_shape,
        grid=(NUM_CORES, tiles_per_core),
        in_specs=[
            pl.BlockSpec((tile_n, emd_dim), lambda c, t: (c * tpc + t, 0)),  # x tile
            pl.BlockSpec((emd_dim, nb_emd), lambda c, t: (0, 0)),            # 2*e (bf16), resident
            pl.BlockSpec((emd_dim, nb_emd), lambda c, t: (0, 0)),            # e (f32), resident
            pl.BlockSpec((1, nb_emd), lambda c, t: (0, 0)),                  # |e_k|^2, resident
        ],
        out_specs=(
            pl.BlockSpec((tile_n, emd_dim), lambda c, t: (c * tpc + t, 0)),  # q tile
            pl.BlockSpec((1, tile_n), lambda c, t: (0, c * tpc + t)),        # ids, lane-dense
            pl.BlockSpec((1, 1, 1), lambda c, t: (c, 0, 0)),                 # diff partial
            pl.BlockSpec((1, 1, nb_emd), lambda c, t: (c, 0, 0)),            # one_sum partial
            pl.BlockSpec((1, emd_dim, nb_emd), lambda c, t: (c, 0, 0)),      # emd_sum partial
        ),
        compiler_params=pltpu.CompilerParams(
            dimension_semantics=("parallel", "arbitrary"),   # core axis // , tile axis carries accs
            vmem_limit_bytes=_vmem_limit_bytes(tile_n, emd_dim, nb_emd),
        ),
    )(flatten, e2_bf, embed_f, e_sq)

    q = q_pad[:n].reshape(x.shape)
    emd_id = ids_row[0, :n].reshape(lead_shape)
    diff = jnp.sum(diff_parts) / jnp.float32(n * emd_dim)

    # Reduce per-core partials, then the tiny O(D*K) EMA update in plain JAX.
    # Torch mutates the registered buffers in place; here they are returned.
    one_sum = jnp.sum(one_parts, axis=0)[0]          # (K,)
    emd_sum = jnp.sum(emd_parts, axis=0)             # (D, K)
    csize_new = cluster_size.astype(jnp.float32) * DECAY + one_sum * (1.0 - DECAY)
    eavg_new = emd_avg.astype(jnp.float32) * DECAY + emd_sum * (1.0 - DECAY)
    n_tot = jnp.sum(csize_new)
    csize_norm = (csize_new + EPS) / (n_tot + nb_emd * EPS) * n_tot
    embed_new = eavg_new / csize_norm[None, :]

    # TODO(synk): straight-through gradient q = x + (q - x).detach() only changes
    # backward; wrap this function in jax.custom_vjp for training parity.
    return q, diff, emd_id, (csize_new, eavg_new, embed_new)


if __name__ == "__main__":
    emd_dim, nb_emd = 32, 128
    B, H, W = 2, 16, 16      # N = 512 rows

    key = jax.random.PRNGKey(0)
    kx, ke = jax.random.split(key)

    embed = jax.random.normal(ke, (emd_dim, nb_emd), dtype=jnp.float32)
    cluster_size = jnp.zeros((nb_emd,), dtype=jnp.float32)
    emd_avg = embed.copy()
    x = jax.random.normal(kx, (B, H, W, emd_dim), dtype=jnp.float32)

    # Default tile_n (clamped to the data -> 256 here, grid (2, 1)).
    q, diff, emd_id, (csize_new, eavg_new, embed_new) = quantizer_forward(
        x, embed, cluster_size, emd_avg)
    jax.block_until_ready((q, diff, emd_id, csize_new, eavg_new, embed_new))

    assert q.shape == x.shape and q.dtype == jnp.float32
    assert emd_id.shape == (B, H, W) and diff.shape == ()
    assert int(emd_id.min()) >= 0 and int(emd_id.max()) < nb_emd

    # ---- verification against the torch semantics (built from kernel ids so
    #      near-tie argmax flips from bf16/matmul precision cannot cause flakiness) ----
    flat = x.reshape(-1, emd_dim)
    k_ids = emd_id.reshape(-1)
    dist = (jnp.sum(flat * flat, 1, keepdims=True)
            - 2.0 * jnp.dot(flat, embed, precision=lax.Precision.HIGHEST)
            + jnp.sum(embed * embed, 0, keepdims=True))
    best = jnp.min(dist, axis=1)
    picked = jnp.take_along_axis(dist, k_ids[:, None], axis=1)[:, 0]
    assert bool(jnp.all(picked <= best + 0.5))          # kernel picks (near-)optimal codes

    ref_q = embed.T[k_ids]
    ref_diff = jnp.mean((ref_q - flat) ** 2)
    onehot = jax.nn.one_hot(k_ids, nb_emd, dtype=jnp.float32)
    ref_csize = cluster_size * DECAY + onehot.sum(0) * (1.0 - DECAY)
    ref_eavg = emd_avg * DECAY + jnp.dot(flat.T, onehot,
                                         precision=lax.Precision.HIGHEST) * (1.0 - DECAY)
    n_tot = ref_csize.sum()
    ref_embed = ref_eavg / ((ref_csize + EPS) / (n_tot + nb_emd * EPS) * n_tot)[None, :]

    tol = dict(rtol=5e-2, atol=5e-2)
    assert jnp.allclose(q.reshape(-1, emd_dim), ref_q, **tol)
    assert jnp.allclose(diff, ref_diff, **tol)
    assert jnp.allclose(csize_new, ref_csize, **tol)
    assert jnp.allclose(eavg_new, ref_eavg, **tol)
    assert jnp.allclose(embed_new, ref_embed, **tol)

    # ---- second call: small explicit tile (test-only) to exercise the
    #      multi-tile accumulation path (grid (2, 2)) and masked rows (N = 480) ----
    x2 = x[:, :, :15, :]
    q2, diff2, id2, (csize2, _, _) = quantizer_forward(
        x2, embed, cluster_size, emd_avg, tile_n=128)
    jax.block_until_ready((q2, diff2, id2, csize2))
    assert q2.shape == x2.shape and id2.shape == x2.shape[:-1]
    assert int(id2.min()) >= 0 and int(id2.max()) < nb_emd
    flat2 = x2.reshape(-1, emd_dim)
    ref_q2 = embed.T[id2.reshape(-1)]
    assert jnp.allclose(q2.reshape(-1, emd_dim), ref_q2, **tol)
    assert jnp.allclose(diff2, jnp.mean((ref_q2 - flat2) ** 2), **tol)
    assert jnp.allclose(jnp.sum(csize2), (1.0 - DECAY) * flat2.shape[0], rtol=1e-3)

    print("KERNEL_OK")
</pallas_src>

<mosaic_0001>
module attributes {stable_mosaic.version = 11 : i64} {
  func.func @kernel(%arg0: i32, %arg1: i32, %arg2: memref<256x32xf32, #tpu.memory_space<vmem>>, %arg3: memref<32x128xbf16, #tpu.memory_space<vmem>>, %arg4: memref<32x128xf32, #tpu.memory_space<vmem>>, %arg5: memref<1x128xf32, #tpu.memory_space<vmem>>, %arg6: memref<256x32xf32, #tpu.memory_space<vmem>>, %arg7: memref<1x256xi32, #tpu.memory_space<vmem>>, %arg8: memref<1x1x1xf32, #tpu.memory_space<vmem>>, %arg9: memref<1x1x128xf32, #tpu.memory_space<vmem>>, %arg10: memref<1x32x128xf32, #tpu.memory_space<vmem>>) attributes {dimension_semantics = [#tpu.dimension_semantics<parallel>, #tpu.dimension_semantics<arbitrary>], iteration_bounds = array<i64: 2, 1>, scalar_prefetch = 0 : i64, scratch_operands = 0 : i64, tpu.core_type = #tpu.core_type<tc>, window_params = [{transform_indices = @transform_0, window_bounds = array<i64: 256, 32>}, {pipeline_mode = #tpu.pipeline_mode<synchronous>, transform_indices = @transform_1, window_bounds = array<i64: 32, 128>}, {pipeline_mode = #tpu.pipeline_mode<synchronous>, transform_indices = @transform_2, window_bounds = array<i64: 32, 128>}, {pipeline_mode = #tpu.pipeline_mode<synchronous>, transform_indices = @transform_3, window_bounds = array<i64: 1, 128>}, {transform_indices = @transform_4, window_bounds = array<i64: 256, 32>}, {transform_indices = @transform_5, window_bounds = array<i64: 1, 256>}, {transform_indices = @transform_6, window_bounds = array<i64: 1, 1, 1>}, {transform_indices = @transform_7, window_bounds = array<i64: 1, 1, 128>}, {transform_indices = @transform_8, window_bounds = array<i64: 1, 32, 128>}]} {
    %c0_i32 = arith.constant 0 : i32
    %0 = arith.cmpi eq, %arg1, %c0_i32 : i32
    %1 = arith.extui %0 : i1 to i32
    %c0_i32_0 = arith.constant 0 : i32
    %2 = arith.cmpi ne, %1, %c0_i32_0 : i32
    scf.if %2 {
      %cst_38 = arith.constant 0.000000e+00 : f32
      %56 = vector.broadcast %cst_38 : f32 to vector<1x1x1xf32>
      %c0_39 = arith.constant 0 : index
      %c0_40 = arith.constant 0 : index
      %c0_41 = arith.constant 0 : index
      %57 = vector.load %arg8[%c0_39, %c0_40, %c0_41] : memref<1x1x1xf32, #tpu.memory_space<vmem>>, vector<1x1x1xf32>
      tpu.vector_store %arg8[%c0_39, %c0_40, %c0_41], %56 {strides = array<i32>} : memref<1x1x1xf32, #tpu.memory_space<vmem>>, vector<1x1x1xf32>,
      %cst_42 = arith.constant 0.000000e+00 : f32
      %58 = vector.broadcast %cst_42 : f32 to vector<1x1x128xf32>
      %c0_43 = arith.constant 0 : index
      %c0_44 = arith.constant 0 : index
      %c0_45 = arith.constant 0 : index
      %59 = vector.load %arg9[%c0_43, %c0_44, %c0_45] : memref<1x1x128xf32, #tpu.memory_space<vmem>>, vector<1x1x128xf32>
      tpu.vector_store %arg9[%c0_43, %c0_44, %c0_45], %58 {strides = array<i32>} : memref<1x1x128xf32, #tpu.memory_space<vmem>>, vector<1x1x128xf32>,
      %cst_46 = arith.constant 0.000000e+00 : f32
      %60 = vector.broadcast %cst_46 : f32 to vector<1x32x128xf32>
      %c0_47 = arith.constant 0 : index
      %c0_48 = arith.constant 0 : index
      %c0_49 = arith.constant 0 : index
      %61 = vector.load %arg10[%c0_47, %c0_48, %c0_49] : memref<1x32x128xf32, #tpu.memory_space<vmem>>, vector<1x32x128xf32>
      tpu.vector_store %arg10[%c0_47, %c0_48, %c0_49], %60 {strides = array<i32>} : memref<1x32x128xf32, #tpu.memory_space<vmem>>, vector<1x32x128xf32>,
    } else {
    }
    %c0 = arith.constant 0 : index
    %c0_1 = arith.constant 0 : index
    %3 = vector.load %arg2[%c0, %c0_1] : memref<256x32xf32, #tpu.memory_space<vmem>>, vector<256x32xf32>
    %c0_2 = arith.constant 0 : index
    %c0_3 = arith.constant 0 : index
    %4 = vector.load %arg4[%c0_2, %c0_3] : memref<32x128xf32, #tpu.memory_space<vmem>>, vector<32x128xf32>
    %c0_4 = arith.constant 0 : index
    %c0_5 = arith.constant 0 : index
    %5 = vector.load %arg3[%c0_4, %c0_5] : memref<32x128xbf16, #tpu.memory_space<vmem>>, vector<32x128xbf16>
    %c0_6 = arith.constant 0 : index
    %c0_7 = arith.constant 0 : index
    %6 = vector.load %arg5[%c0_6, %c0_7] : memref<1x128xf32, #tpu.memory_space<vmem>>, vector<1x128xf32>
    %7 = arith.truncf %3 : vector<256x32xf32> to vector<256x32xbf16>
    %cst = arith.constant dense<0.000000e+00> : vector<256x128xf32>
    %8 = tpu.matmul %7, %5, %cst {dimension_numbers = #tpu.dot_dimension_numbers<[1], [0], [0], [1], [0, 0, 1, 1], [], []>} : vector<256x32xbf16>, vector<32x128xbf16>, vector<256x128xf32> -> vector<256x128xf32>
    %9 = vector.broadcast %6 : vector<1x128xf32> to vector<256x128xf32>
    %10 = arith.subf %8, %9 : vector<256x128xf32>
    %cst_8 = arith.constant dense<0xFF800000> : vector<256xf32>
    %11 = vector.multi_reduction <maximumf>, %10, %cst_8 [1] : vector<256x128xf32> to vector<256xf32>
    %12 = vector.shape_cast %11 : vector<256xf32> to vector<256x1xf32>
    %13 = tpu.iota {dimensions = array<i32: 1>} : vector<256x128xi32>
    %14 = vector.broadcast %12 : vector<256x1xf32> to vector<256x128xf32>
    %15 = arith.cmpf oeq, %10, %14 : vector<256x128xf32>
    %c128_i32 = arith.constant 128 : i32
    %16 = vector.broadcast %c128_i32 : i32 to vector<256x128xi32>
    %17 = arith.select %15, %13, %16 : vector<256x128xi1>, vector<256x128xi32>
    %cst_9 = arith.constant dense<2147483647> : vector<256xi32>
    %18 = vector.multi_reduction <minsi>, %17, %cst_9 [1] : vector<256x128xi32> to vector<256xi32>
    %19 = vector.shape_cast %18 : vector<256xi32> to vector<256x1xi32>
    %20 = vector.broadcast %19 : vector<256x1xi32> to vector<256x128xi32>
    %21 = arith.cmpi eq, %13, %20 : vector<256x128xi32>
    %22 = arith.extui %21 : vector<256x128xi1> to vector<256x128xi32>
    %23 = arith.sitofp %22 : vector<256x128xi32> to vector<256x128xf32>
    %24 = tpu.iota {dimensions = array<i32: 1>} : vector<1x128xi32>
    %25 = arith.sitofp %24 : vector<1x128xi32> to vector<1x128xf32>
    %cst_10 = arith.constant dense<0.000000e+00> : vector<1x256xf32>
    %26 = tpu.matmul %25, %23, %cst_10 {dimension_numbers = #tpu.dot_dimension_numbers<[1], [1], [0], [0], [0, 0, 1, 0], [], []>} : vector<1x128xf32>, vector<256x128xf32>, vector<1x256xf32> -> vector<1x256xf32>
    %27 = arith.fptosi %26 : vector<1x256xf32> to vector<1x256xi32>
    %c0_11 = arith.constant 0 : index
    %c0_12 = arith.constant 0 : index
    %28 = vector.load %arg7[%c0_11, %c0_12] : memref<1x256xi32, #tpu.memory_space<vmem>>, vector<1x256xi32>
    tpu.vector_store %arg7[%c0_11, %c0_12], %27 {strides = array<i32>} : memref<1x256xi32, #tpu.memory_space<vmem>>, vector<1x256xi32>,
    %cst_13 = arith.constant dense<0.000000e+00> : vector<256x32xf32>
    %29 = tpu.matmul %23, %4, %cst_13 {dimension_numbers = #tpu.dot_dimension_numbers<[1], [1], [0], [0], [0, 0, 1, 0], [], []>} : vector<256x128xf32>, vector<32x128xf32>, vector<256x32xf32> -> vector<256x32xf32>
    %c0_14 = arith.constant 0 : index
    %c0_15 = arith.constant 0 : index
    %30 = vector.load %arg6[%c0_14, %c0_15] : memref<256x32xf32, #tpu.memory_space<vmem>>, vector<256x32xf32>
    tpu.vector_store %arg6[%c0_14, %c0_15], %29 {strides = array<i32>} : memref<256x32xf32, #tpu.memory_space<vmem>>, vector<256x32xf32>,
    %c0_16 = arith.constant 0 : index
    %c0_17 = arith.constant 0 : index
    %c0_18 = arith.constant 0 : index
    %31 = vector.load %arg8[%c0_16, %c0_17, %c0_18] : memref<1x1x1xf32, #tpu.memory_space<vmem>>, vector<1x1x1xf32>
    %32 = arith.mulf %3, %3 : vector<256x32xf32>
    %33 = vector.shape_cast %32 : vector<256x32xf32> to vector<1x256x32xf32>
    %cst_19 = arith.constant dense<0.000000e+00> : vector<1xf32>
    %34 = vector.multi_reduction <add>, %33, %cst_19 [1, 2] : vector<1x256x32xf32> to vector<1xf32>
    %35 = vector.shape_cast %34 : vector<1xf32> to vector<1x1x1xf32>
    %36 = vector.extract %35[0, 0, 0] : f32 from vector<1x1x1xf32>
    %37 = vector.shape_cast %12 : vector<256x1xf32> to vector<1x256x1xf32>
    %cst_20 = arith.constant dense<0.000000e+00> : vector<1xf32>
    %38 = vector.multi_reduction <add>, %37, %cst_20 [1, 2] : vector<1x256x1xf32> to vector<1xf32>
    %39 = vector.shape_cast %38 : vector<1xf32> to vector<1x1x1xf32>
    %40 = vector.extract %39[0, 0, 0] : f32 from vector<1x1x1xf32>
    %41 = arith.subf %36, %40 : f32
    %42 = vector.broadcast %41 : f32 to vector<1x1x1xf32>
    %43 = arith.addf %31, %42 : vector<1x1x1xf32>
    %c0_21 = arith.constant 0 : index
    %c0_22 = arith.constant 0 : index
    %c0_23 = arith.constant 0 : index
    %44 = vector.load %arg8[%c0_21, %c0_22, %c0_23] : memref<1x1x1xf32, #tpu.memory_space<vmem>>, vector<1x1x1xf32>
    tpu.vector_store %arg8[%c0_21, %c0_22, %c0_23], %43 {strides = array<i32>} : memref<1x1x1xf32, #tpu.memory_space<vmem>>, vector<1x1x1xf32>,
    %c0_24 = arith.constant 0 : index
    %c0_25 = arith.constant 0 : index
    %c0_26 = arith.constant 0 : index
    %45 = vector.load %arg9[%c0_24, %c0_25, %c0_26] : memref<1x1x128xf32, #tpu.memory_space<vmem>>, vector<1x1x128xf32>
    %cst_27 = arith.constant dense<0.000000e+00> : vector<128xf32>
    %46 = vector.multi_reduction <add>, %23, %cst_27 [0] : vector<256x128xf32> to vector<128xf32>
    %47 = vector.shape_cast %46 : vector<128xf32> to vector<1x128xf32>
    %48 = vector.shape_cast %47 : vector<1x128xf32> to vector<1x1x128xf32>
    %49 = arith.addf %45, %48 : vector<1x1x128xf32>
    %c0_28 = arith.constant 0 : index
    %c0_29 = arith.constant 0 : index
    %c0_30 = arith.constant 0 : index
    %50 = vector.load %arg9[%c0_28, %c0_29, %c0_30] : memref<1x1x128xf32, #tpu.memory_space<vmem>>, vector<1x1x128xf32>
    tpu.vector_store %arg9[%c0_28, %c0_29, %c0_30], %49 {strides = array<i32>} : memref<1x1x128xf32, #tpu.memory_space<vmem>>, vector<1x1x128xf32>,
    %c0_31 = arith.constant 0 : index
    %c0_32 = arith.constant 0 : index
    %c0_33 = arith.constant 0 : index
    %51 = vector.load %arg10[%c0_31, %c0_32, %c0_33] : memref<1x32x128xf32, #tpu.memory_space<vmem>>, vector<1x32x128xf32>
    %cst_34 = arith.constant dense<0.000000e+00> : vector<32x128xf32>
    %52 = tpu.matmul %3, %23, %cst_34 {dimension_numbers = #tpu.dot_dimension_numbers<[0], [0], [1], [1], [0, 1, 1, 1], [], []>} : vector<256x32xf32>, vector<256x128xf32>, vector<32x128xf32> -> vector<32x128xf32>
    %53 = vector.shape_cast %52 : vector<32x128xf32> to vector<1x32x128xf32>
    %54 = arith.addf %51, %53 : vector<1x32x128xf32>
    %c0_35 = arith.constant 0 : index
    %c0_36 = arith.constant 0 : index
    %c0_37 = arith.constant 0 : index
    %55 = vector.load %arg10[%c0_35, %c0_36, %c0_37] : memref<1x32x128xf32, #tpu.memory_space<vmem>>, vector<1x32x128xf32>
    tpu.vector_store %arg10[%c0_35, %c0_36, %c0_37], %54 {strides = array<i32>} : memref<1x32x128xf32, #tpu.memory_space<vmem>>, vector<1x32x128xf32>,
    return
  }
  func.func @transform_0(%arg0: i32, %arg1: i32) -> (i32, i32) {
    %c1_i32 = arith.constant 1 : i32
    %0 = arith.muli %arg0, %c1_i32 : i32
    %1 = arith.addi %0, %arg1 : i32
    %c0_i32 = arith.constant 0 : i32
    %c0_i32_0 = arith.constant 0 : i32
    return %1, %c0_i32 : i32, i32
  }
  func.func @transform_1(%arg0: i32, %arg1: i32) -> (i32, i32) {
    %c0_i32 = arith.constant 0 : i32
    %c0_i32_0 = arith.constant 0 : i32
    %c0_i32_1 = arith.constant 0 : i32
    return %c0_i32, %c0_i32_0 : i32, i32
  }
  func.func @transform_2(%arg0: i32, %arg1: i32) -> (i32, i32) {
    %c0_i32 = arith.constant 0 : i32
    %c0_i32_0 = arith.constant 0 : i32
    %c0_i32_1 = arith.constant 0 : i32
    return %c0_i32, %c0_i32_0 : i32, i32
  }
  func.func @transform_3(%arg0: i32, %arg1: i32) -> (i32, i32) {
    %c0_i32 = arith.constant 0 : i32
    %c0_i32_0 = arith.constant 0 : i32
    %c0_i32_1 = arith.constant 0 : i32
    return %c0_i32, %c0_i32_0 : i32, i32
  }
  func.func @transform_4(%arg0: i32, %arg1: i32) -> (i32, i32) {
    %c1_i32 = arith.constant 1 : i32
    %0 = arith.muli %arg0, %c1_i32 : i32
    %1 = arith.addi %0, %arg1 : i32
    %c0_i32 = arith.constant 0 : i32
    %c0_i32_0 = arith.constant 0 : i32
    return %1, %c0_i32 : i32, i32
  }
  func.func @transform_5(%arg0: i32, %arg1: i32) -> (i32, i32) {
    %c1_i32 = arith.constant 1 : i32
    %0 = arith.muli %arg0, %c1_i32 : i32
    %1 = arith.addi %0, %arg1 : i32
    %c0_i32 = arith.constant 0 : i32
    %c0_i32_0 = arith.constant 0 : i32
    return %c0_i32, %1 : i32, i32
  }
  func.func @transform_6(%arg0: i32, %arg1: i32) -> (i32, i32, i32) {
    %c0_i32 = arith.constant 0 : i32
    %c0_i32_0 = arith.constant 0 : i32
    %c0_i32_1 = arith.constant 0 : i32
    return %arg0, %c0_i32, %c0_i32_0 : i32, i32, i32
  }
  func.func @transform_7(%arg0: i32, %arg1: i32) -> (i32, i32, i32) {
    %c0_i32 = arith.constant 0 : i32
    %c0_i32_0 = arith.constant 0 : i32
    %c0_i32_1 = arith.constant 0 : i32
    return %arg0, %c0_i32, %c0_i32_0 : i32, i32, i32
  }
  func.func @transform_8(%arg0: i32, %arg1: i32) -> (i32, i32, i32) {
    %c0_i32 = arith.constant 0 : i32
    %c0_i32_0 = arith.constant 0 : i32
    %c0_i32_1 = arith.constant 0 : i32
    return %arg0, %c0_i32, %c0_i32_0 : i32, i32, i32
  }
}

</mosaic_0001>

<bundles_post_ra>
// kernel: tpu_custom_call.1
= control target key start
LH: loop header
LB: loop body
LE: loop exit
PB: predicated region body
PF: predicated region fallthrough
CT: control target
= control target key end

     0   :  { %s4915_s0 = inlined_call_operand.vmem [shape: f32[512,32], index: 0, kind: input, shape index: {}]   ;;  %s4916_s1 = inlined_call_operand.vmem [shape: bf16[32,128], index: 1, kind: input, shape index: {}]   ;;  %s4917_s2 = inlined_call_operand.vmem [shape: f32[32,128], index: 2, kind: input, shape index: {}]   ;;  %s4918_s3 = inlined_call_operand.vmem [shape: f32[1,128], index: 3, kind: input, shape index: {}]   ;;  %s4919_s4 = inlined_call_operand.vmem [shape: f32[512,32], index: 4, kind: output, shape index: {0}]   ;;  %s4920_s5 = inlined_call_operand.hbm [shape: s32[1,512], index: 5, kind: output, shape index: {1}]   ;;  %s4921_s6 = inlined_call_operand.vmem [shape: f32[2,1,1], index: 6, kind: output, shape index: {2}]   ;;  %s4922_s7 = inlined_call_operand.hbm [shape: f32[2,1,128], index: 7, kind: output, shape index: {3}]   ;;  %s4923_s8 = inlined_call_operand.hbm [shape: f32[2,32,128], index: 8, kind: output, shape index: {4}]  }
   0x1   :  { %4971 = sst [smem:[#allocation46_spill]] %s4915_s0 }
   0x2   :  { %4972 = sst [smem:[#allocation47_spill]] %s4916_s1 }
   0x3   :  { %4973 = sst [smem:[#allocation48_spill]] %s4917_s2 }
   0x4   :  { %4974 = sst [smem:[#allocation49_spill]] %s4918_s3 }
   0x5   :  { %4975 = sst [smem:[#allocation50_spill]] %s4921_s6 }
   0x6   :  { %14 = vsyncpa [#allocation3], 0 }
   0x7   :  { %16 = vsyncpa [#allocation3 + $0x1], 0 }
   0x8   :  { %17 = vsyncpa [#allocation5], 0 }
   0x9   :  { %19 = vsyncpa [#allocation5 + $0x1], 0  ;;  %s3179_s27 = smov 0   ;;  %s3181_s28 = smov 0  }
   0xa   :  { %s3183_s29 = smov 0   ;;  %s3185_s30 = smov 0  }
   0xb   :  { %s3187_s9 = smov 0   ;;  %s3189_s10 = smov 0  }
   0xc LB: > { %s2351_s11 = sadd.s32 4294967295, %s3123_s10   ;;  %s4969_s12 = sadd.s32 4294967294, %s3123_s10   ;;  %s3123_s10 = sphi %s3189_s10, %s25_s10   ;;  %s3119_s9 = sphi %s3187_s9, %s5121_s9   ;;  %s3115_s30 = sphi %s3185_s30, %s5120_s30   ;;  %s3111_s29 = sphi %s3183_s29, %s5119_s29   ;;  %s3107_s28 = sphi %s3181_s28, %s5118_s28   ;;  %s3103_s27 = sphi %s3179_s27, %s5117_s27  }
   0xd   : > { %s37_s13 = sadd.s32 1, %s3119_s9  ;;  %s165_s14 = sadd.s32 1, %s3111_s29 }
   0xe   : > { %p39_p0 = scmp.ge.s32.totalorder %s37_s13, 2  ;;  %p175_p1 = scmp.ne.s32.totalorder %s3111_s29, %s3107_s28 }
   0xf   : > { %p176_p2 = scmp.eq.s32.totalorder %s2351_s11, 1  ;;  %p181_p3 = scmp.ne.s32.totalorder %s3107_s28, %s3103_s27 }
  0x10   : > { %s5123_s13 = smov (%p39_p0, %s37_s13), 0  ;;  %p182_p5 = scmp.eq.s32.totalorder %s4969_s12, 1 }
  0x11   : > { %p3221_p4 = por %p176_p2, %p175_p1  ;;  %s162_s16 = ssub.s32 %s3119_s9, %s5123_s13 }
  0x12   : > { %p2355_p6 = scmp.ge.s32.totalorder %s3123_s10, 1  ;;  %p163_p7 = scmp.eq.s32.totalorder %s162_s16, 0 }
  0x13   : > { %p3230_p8 = por %p182_p5, %p181_p3  ;;  %p298_p9 = scmp.lt.s32.totalorder %s3123_s10, 3 }
  0x14   : > { %s3236_s18 = scalar_select %p163_p7, %s3111_s29, %s165_s14  }
  0x15   : > { %p299_p10 = pnand %p2355_p6, %p298_p9 }
  0x17   : > { %302 = sbr.rel (%p299_p10) target bundleno = 1066 (0x42a), region = 36 }
  0x1e   : > { %s4978_s1 = sld [smem:[#allocation47_spill]]  ;;  %s3242_s21 = sshll.u32 %s3115_s30, 5  ;;  %vm4968_vm0 = vcmask 261120   ;;  %vm1831_vm3 = vcmask 7168  }
  0x1f   : > { %p353_p11 = scmp.lt.s32.totalorder %s3242_s21, 63  ;;  %s4979_s0 = sld [smem:[#allocation46_spill]] }
  0x20   : > { %s4989_s3 = sld [smem:[#allocation49_spill]]  ;;  %s5024_s2 = sld [smem:[#allocation48_spill]] }
  0x21   : > { %s3249_s24 = scalar_select %p353_p11, %s3242_s21, 63 }
  0x22   : > { %s4164_s26 = sand.u32 1, %s3107_s28   ;;  %p369_p12 = scmp.lt.s32.totalorder %s3115_s30, 1 }
  0x23   : > { %s4970_s25 = sshll.u32 %s3249_s24, 3  ;;  %s4169_s14 = scalar_lea.vmem [#allocation4], %s4164_s26 }
  0x24   : > { %v2951_v0 = vld [vmem:[%s4978_s1] sm:$0xff]   ;;  %v2952_v1 = vld [vmem:[%s4978_s1 + $0x8] sm:$0xff]   ;;  %s370_s19 = scalar_select %p369_p12, %s3115_s30, 1 }
  0x25   : > { %2652 = vmatprep.subr.bf16.mxu1 %v2951_v0  ;;  %s3257_s16 = scalar_lea.vmem %s4979_s0, %s4970_s25  ;;  %s5065_s6 = sld [smem:[#allocation50_spill]] }
  0x26   : > { %2653 = vmatpush3.bf16.msra.mxu1 %v2951_v0  ;;  %v3260_v2 = vld [vmem:[%s3257_s16] sm:$0xff]  ;;  %v3263_v3 = vld [vmem:[%s3257_s16 + $0x8] sm:$0xff]  ;;  %v3266_v4 = vld [vmem:[%s3257_s16 + $0x10] sm:$0xff]  ;;  %s4715_s22 = sand.u32 1, %s2351_s11   ;;  %s2513_s12 = sshll.u32 %s3115_s30, 4 }
  0x27   : > { %2654 = vmatprep.subr.bf16.mxu1 %v2952_v1  ;;  %v425_v5 = vpack.c.bf16 %v3263_v3, %v3260_v2  ;;  %v3271_v6 = vld [vmem:[%s3257_s16 + $0x18] sm:$0xff]  ;;  %v3274_v7 = vld [vmem:[%s3257_s16 + $0x20] sm:$0xff]  ;;  %v3277_v8 = vld [vmem:[%s3257_s16 + $0x28] sm:$0xff]  ;;  %s4721_s1 = scalar_lea.hbm %s4922_s7, %s2513_s12 }
  0x28   : > { %v426_v9 = vpack.c.bf16 %v3271_v6, %v3266_v4  ;;  %v427_v10 = vpack.c.bf16 %v3277_v8, %v3274_v7  ;;  %v3287_v11 = vld [vmem:[%s3257_s16 + $0x30] sm:$0xff]  ;;  %v3290_v12 = vld [vmem:[%s3257_s16 + $0x38] sm:$0xff]  ;;  %v3293_v13 = vld [vmem:[%s3257_s16 + $0x40] sm:$0xff] }
  0x29   : > { %2656 = vmatprep.mubr.msk.bf16.mxu1 %vm4968_vm0, %v425_v5  ;;  %v3296_v14 = vld [vmem:[%s3257_s16 + $0x48] sm:$0xff]  ;;  %v428_v15 = vpack.c.bf16 %v3290_v12, %v3287_v11  ;;  %v3305_v17 = vld [vmem:[%s3257_s16 + $0x50] sm:$0xff]  ;;  %v3308_v18 = vld [vmem:[%s3257_s16 + $0x58] sm:$0xff] }
  0x2a   : > { %2655 = vmatpush3.bf16.msra.mxu1 %v2952_v1  ;;  %v429_v16 = vpack.c.bf16 %v3296_v14, %v3293_v13  ;;  %v3311_v19 = vld [vmem:[%s3257_s16 + $0x60] sm:$0xff]  ;;  %v3314_v20 = vld [vmem:[%s3257_s16 + $0x68] sm:$0xff]  ;;  %v430_v21 = vpack.c.bf16 %v3308_v18, %v3305_v17  ;;  %v3323_v23 = vld [vmem:[%s3257_s16 + $0x70] sm:$0xff] }
  0x2b   : > { %4980 = vst [vmem:[#allocation9_spill] sm:$0xff] %v3314_v20  ;;  %v431_v22 = vpack.c.bf16 %v3314_v20, %v3311_v19  ;;  %4981 = vst [vmem:[#allocation10_spill] sm:$0xff] %v3323_v23  ;;  %v3326_v24 = vld [vmem:[%s3257_s16 + $0x78] sm:$0xff]  ;;  %v3329_v25 = vld [vmem:[%s3257_s16 + $0x80] sm:$0xff]  ;;  %s4265_s23 = scalar_lea.vmem %s5065_s6, %s370_s19 }
  0x2c   : > { %4982 = vst [vmem:[#allocation11_spill] sm:$0xff] %v3326_v24  ;;  %4983 = vst [vmem:[#allocation12_spill] sm:$0xff] %v3329_v25  ;;  %v3332_v26 = vld [vmem:[%s3257_s16 + $0x88] sm:$0xff]  ;;  %v432_v27 = vpack.c.bf16 %v3326_v24, %v3323_v23  ;;  %v3341_v29 = vld [vmem:[%s3257_s16 + $0x90] sm:$0xff] }
  0x2d   : > { %2657 = vmatmul.mubr.msk.bf16.vlgmr.msra.gmra.mrb[0].mxu1 %vm4968_vm0, %v426_v9  ;;  %4984 = vst [vmem:[#allocation13_spill] sm:$0xff] %v3332_v26  ;;  %v433_v28 = vpack.c.bf16 %v3332_v26, %v3329_v25  ;;  %4985 = vst [vmem:[#allocation14_spill] sm:$0xff] %v3341_v29  ;;  %v3344_v30 = vld [vmem:[%s3257_s16 + $0x98] sm:$0xff]  ;;  %v3347_v31 = vld [vmem:[%s3257_s16 + $0xa0] sm:$0xff] }
  0x2e   : > { %2660 = vmatprep.mubr.msk.bf16.mxu1 %vm4968_vm0, %v427_v10  ;;  %4986 = vst [vmem:[#allocation15_spill] sm:$0xff] %v3344_v30  ;;  %4987 = vst [vmem:[#allocation16_spill] sm:$0xff] %v3347_v31  ;;  %v3350_v32 = vld [vmem:[%s3257_s16 + $0xa8] sm:$0xff]  ;;  %v434_v33 = vpack.c.bf16 %v3344_v30, %v3341_v29  ;;  %v406_v35 = vld [vmem:[%s3257_s16 + $0xb0] sm:$0xff] }
  0x2f   : > { %4988 = vst [vmem:[#allocation17_spill] sm:$0xff] %v3350_v32  ;;  %v435_v34 = vpack.c.bf16 %v3350_v32, %v3347_v31  ;;  %v407_v36 = vld [vmem:[%s3257_s16 + $0xb8] sm:$0xff]  ;;  %v408_v37 = vld [vmem:[%s3257_s16 + $0xc0] sm:$0xff]  ;;  %v409_v38 = vld [vmem:[%s3257_s16 + $0xc8] sm:$0xff] }
  0x30   : > { %v436_v39 = vpack.c.bf16 %v407_v36, %v406_v35  ;;  %v437_v40 = vpack.c.bf16 %v409_v38, %v408_v37  ;;  %v410_v41 = vld [vmem:[%s3257_s16 + $0xd0] sm:$0xff]  ;;  %v411_v42 = vld [vmem:[%s3257_s16 + $0xd8] sm:$0xff]  ;;  %v412_v43 = vld [vmem:[%s3257_s16 + $0xe0] sm:$0xff] }
  0x31   : > { %v413_v44 = vld [vmem:[%s3257_s16 + $0xe8] sm:$0xff]  ;;  %v438_v45 = vpack.c.bf16 %v411_v42, %v410_v41  ;;  %v414_v47 = vld [vmem:[%s3257_s16 + $0xf0] sm:$0xff]  ;;  %v415_v48 = vld [vmem:[%s3257_s16 + $0xf8] sm:$0xff] }
  0x32   : > { %v439_v46 = vpack.c.bf16 %v413_v44, %v412_v43  ;;  %v440_v49 = vpack.c.bf16 %v415_v48, %v414_v47  ;;  %v3376_v50 = vld [vmem:[%s4989_s3] ss:$0 sm:$0xff]  ;;  %s2125_s3 = scalar_lea.sflag [#allocation5], %s4715_s22 }
  0x35   : > { %2661 = vmatmul.mubr.msk.bf16.gmra.mrb[4].mxu1 %vm4968_vm0, %v428_v15 }
  0x36   : > { %2664 = vmatprep.mubr.msk.bf16.mxu1 %vm4968_vm0, %v429_v16 }
  0x3d   : > { %2665 = vmatmul.mubr.msk.bf16.gmra.mrb[8].mxu1 %vm4968_vm0, %v430_v21 }
  0x3e   : > { %2668 = vmatprep.mubr.msk.bf16.mxu1 %vm4968_vm0, %v431_v22 }
  0x45   : > { %2669 = vmatmul.mubr.msk.bf16.gmra.mrb[12].mxu1 %vm4968_vm0, %v432_v27 }
  0x46   : > { %2672 = vmatprep.mubr.msk.bf16.mxu1 %vm4968_vm0, %v433_v28 }
  0x4d   : > { %2673 = vmatmul.mubr.msk.bf16.gmra.mrb[16].mxu1 %vm4968_vm0, %v434_v33 }
  0x4e   : > { %2676 = vmatprep.mubr.msk.bf16.mxu1 %vm4968_vm0, %v435_v34 }
  0x55   : > { %2677 = vmatmul.mubr.msk.bf16.gmra.mrb[20].mxu1 %vm4968_vm0, %v436_v39 }
  0x56   : > { %2680 = vmatprep.mubr.msk.bf16.mxu1 %vm4968_vm0, %v437_v40 }
  0x5d   : > { %2681 = vmatmul.mubr.msk.bf16.gmra.mrb[24].mxu1 %vm4968_vm0, %v438_v45 }
  0x5e   : > { %2684 = vmatprep.mubr.msk.bf16.mxu1 %vm4968_vm0, %v439_v46 }
  0x65   : > { %2685 = vmatmul.mubr.msk.bf16.gmra.mrb[28].mxu1 %vm4968_vm0, %v440_v49 }
 0x100   : > { %v2658_v51 = vpop.f32.mrb[0].mxu1 }
 0x101   : > { %v3379_v52 = vsub.f32 %v2658_v51, %v3376_v50  ;;  %v536_v53 = vpop.f32.mrb[1].mxu1 }
 0x102   : > { %v3382_v54 = vsub.f32 %v536_v53, %v3376_v50  ;;  %v2659_v55 = vpop.f32.mrb[2].mxu1 }
 0x103   : > { %705 = vmax.xlane.f32.xlu0 %v3379_v52  ;;  %v539_v56 = vpop.f32.mrb[3].mxu1  ;;  %v3387_v57 = vsub.f32 %v2659_v55, %v3376_v50 }
 0x104   : > { %701 = vmax.xlane.f32.xlu1 %v3382_v54  ;;  %v3394_v61 = vsub.f32 %v539_v56, %v3376_v50 }
 0x108   : > { %707 = vmax.xlane.f32.xlu1 %v3387_v57  ;;  %v2662_v58 = vpop.f32.mrb[4].mxu1 }
 0x109   : > { %v3391_v59 = vsub.f32 %v2662_v58, %v3376_v50  ;;  %v552_v60 = vpop.f32.mrb[5].mxu1 }
 0x10a   : > { %v2663_v62 = vpop.f32.mrb[6].mxu1  ;;  %v3399_v0 = vsub.f32 %v552_v60, %v3376_v50 }
 0x10b   : > { %713 = vmax.xlane.f32.xlu0 %v3391_v59  ;;  %v555_v63 = vpop.f32.mrb[7].mxu1  ;;  %v3402_v1 = vsub.f32 %v2663_v62, %v3376_v50 }
 0x10c   : > { %703 = vmax.xlane.f32.xlu1 %v3394_v61  ;;  %v3410_v15 = vsub.f32 %v555_v63, %v3376_v50 }
 0x10f   : > { %709 = vmax.xlane.f32.xlu0 %v3399_v0 }
 0x110   : > { %715 = vmax.xlane.f32.xlu1 %v3402_v1  ;;  %v2666_v5 = vpop.f32.mrb[8].mxu1 }
 0x111   : > { %v3407_v9 = vsub.f32 %v2666_v5, %v3376_v50  ;;  %v568_v10 = vpop.f32.mrb[9].mxu1 }
 0x112   : > { %v2667_v16 = vpop.f32.mrb[10].mxu1  ;;  %v3415_v22 = vsub.f32 %v568_v10, %v3376_v50 }
 0x113   : > { %721 = vmax.xlane.f32.xlu0 %v3407_v9  ;;  %v571_v21 = vpop.f32.mrb[11].mxu1  ;;  %v3434_v43 = vsub.f32 %v2667_v16, %v3376_v50 }
 0x114   : > { %711 = vmax.xlane.f32.xlu1 %v3410_v15  ;;  %v3418_v27 = vsub.f32 %v571_v21, %v3376_v50 }
 0x117   : > { %717 = vmax.xlane.f32.xlu0 %v3415_v22 }
 0x118   : > { %719 = vmax.xlane.f32.xlu1 %v3418_v27  ;;  %v2670_v28 = vpop.f32.mrb[12].mxu1 }
 0x119   : > { %v584_v33 = vpop.f32.mrb[13].mxu1 }
 0x11a   : > { %v2671_v34 = vpop.f32.mrb[14].mxu1  ;;  %v3465_v10 = vsub.f32 %v584_v33, %v3376_v50 }
 0x11b   : > { %v587_v35 = vpop.f32.mrb[15].mxu1  ;;  %v3470_v16 = vsub.f32 %v2671_v34, %v3376_v50 }
 0x11c   : > { %v3462_v5 = vsub.f32 %v587_v35, %v3376_v50 }
 0x120   : > { %v2674_v36 = vpop.f32.mrb[16].mxu1 }
 0x121   : > { %v3423_v37 = vsub.f32 %v2674_v36, %v3376_v50  ;;  %v600_v38 = vpop.f32.mrb[17].mxu1  ;;  %v3473_v36 = vsub.f32 %v2670_v28, %v3376_v50 }
 0x122   : > { %v2675_v39 = vpop.f32.mrb[18].mxu1  ;;  %v3430_v42 = vsub.f32 %v600_v38, %v3376_v50 }
 0x123   : > { %v3426_v40 = vsub.f32 %v2675_v39, %v3376_v50  ;;  %737 = vmax.xlane.f32.xlu0 %v3423_v37  ;;  %v603_v41 = vpop.f32.mrb[19].mxu1 }
 0x124   : > { %v3438_v45 = vsub.f32 %v603_v41, %v3376_v50 }
 0x125   : > { %739 = vmax.xlane.f32.xlu1 %v3426_v40 }
 0x127   : > { %733 = vmax.xlane.f32.xlu0 %v3430_v42 }
 0x128   : > { %v2678_v44 = vpop.f32.mrb[20].mxu1 }
 0x129   : > { %723 = vmax.xlane.f32.xlu1 %v3434_v43  ;;  %v616_v46 = vpop.f32.mrb[21].mxu1  ;;  %v3442_v48 = vsub.f32 %v2678_v44, %v3376_v50 }
 0x12a   : > { %v2679_v47 = vpop.f32.mrb[22].mxu1  ;;  %v3453_v55 = vsub.f32 %v616_v46, %v3376_v50 }
 0x12b   : > { %735 = vmax.xlane.f32.xlu0 %v3438_v45  ;;  %v619_v49 = vpop.f32.mrb[23].mxu1  ;;  %v3449_v53 = vsub.f32 %v2679_v47, %v3376_v50 }
 0x12c   : > { %v3446_v51 = vsub.f32 %v619_v49, %v3376_v50  ;;  %v4924_v49 = vlaneseq }
 0x12e   : > { %743 = vmax.xlane.f32.xlu1 %v3446_v51 }
 0x12f   : > { %745 = vmax.xlane.f32.xlu0 %v3442_v48 }
 0x130   : > { %v2682_v56 = vpop.f32.mrb[24].mxu1 }
 0x131   : > { %v3457_v58 = vsub.f32 %v2682_v56, %v3376_v50  ;;  %v632_v60 = vpop.f32.mrb[25].mxu1 }
 0x132   : > { %747 = vmax.xlane.f32.xlu1 %v3449_v53  ;;  %v2683_v62 = vpop.f32.mrb[26].mxu1  ;;  %v3486_v34 = vsub.f32 %v632_v60, %v3376_v50 }
 0x133   : > { %741 = vmax.xlane.f32.xlu0 %v3453_v55  ;;  %v635_v63 = vpop.f32.mrb[27].mxu1  ;;  %v3496_v47 = vsub.f32 %v2683_v62, %v3376_v50 }
 0x134   : > { %v3480_v33 = vsub.f32 %v635_v63, %v3376_v50 }
 0x136   : > { %727 = vmax.xlane.f32.xlu1 %v3462_v5 }
 0x137   : > { %725 = vmax.xlane.f32.xlu0 %v3465_v10 }
 0x138   : > { %v2686_v21 = vpop.f32.mrb[28].mxu1 }
 0x139   : > { %v3476_v38 = vsub.f32 %v2686_v21, %v3376_v50  ;;  %v648_v39 = vpop.f32.mrb[29].mxu1 }
 0x13a   : > { %731 = vmax.xlane.f32.xlu1 %v3470_v16  ;;  %v3483_v35 = vsub.f32 %v648_v39, %v3376_v50  ;;  %v2687_v41 = vpop.f32.mrb[30].mxu1 }
 0x13b   : > { %729 = vmax.xlane.f32.xlu0 %v3473_v36  ;;  %v3490_v28 = vsub.f32 %v2687_v41, %v3376_v50  ;;  %v651_v44 = vpop.f32.mrb[31].mxu1 }
 0x13c   : > { %v3493_v46 = vsub.f32 %v651_v44, %v3376_v50  ;;  %v3507_v50 = vand.u32 127, %v4924_v49 }
 0x13e   : > { %751 = vmax.xlane.f32.xlu1 %v3480_v33 }
 0x13f   : > { %749 = vmax.xlane.f32.xlu0 %v3486_v34 }
 0x142   : > { %755 = vmax.xlane.f32.xlu1 %v3496_v47 }
 0x143   : > { %753 = vmax.xlane.f32.xlu0 %v3457_v58 }
 0x146   : > { %759 = vmax.xlane.f32.xlu1 %v3493_v46 }
 0x147   : > { %757 = vmax.xlane.f32.xlu0 %v3483_v35 }
 0x14a   : > { %763 = vmax.xlane.f32.xlu1 %v3490_v28 }
 0x14b   : > { %761 = vmax.xlane.f32.xlu0 %v3476_v38 }
 0x190   : > { %v706_v56 = vpop.xlane.xlu0 %705 }
 0x191   : > { %vm769_vm1 = vcmp.eq.f32.partialorder %v3379_v52, %v706_v56  ;;  %v702_v60 = vpop.xlane.xlu1 %701 }
 0x192   : > { %v3511_v62 = vsel %vm769_vm1, %v3507_v50, 128  ;;  %vm767_vm2 = vcmp.eq.f32.partialorder %v3382_v54, %v702_v60  ;;  %v1832_v32 = vsel %vm1831_vm3, %v702_v60, 0.0  ;;  %v1835_v60 = vsel %vm1831_vm3, %v706_v56, 0.0 }
 0x193   : > { %v860_v63 = vshra.s32 %v3511_v62, 16  ;;  %v3516_v21 = vsel %vm767_vm2, %v3507_v50, 128 }
 0x194   : > { %v832_v44 = vshra.s32 %v3516_v21, 16 }
 0x195   : > { %v708_v39 = vpop.xlane.xlu1 %707  ;;  %v3518_v41 = vcvt.s32.f32 %v860_v63 }
 0x196   : > { %vm770_vm4 = vcmp.eq.f32.partialorder %v3387_v57, %v708_v39  ;;  %v3529_v63 = vcvt.s32.f32 %v832_v44  ;;  %v1837_v23 = vsel %vm1831_vm3, %v708_v39, 0.0 }
 0x197   : > { %v3523_v52 = vsel %vm770_vm4, %v3507_v50, 128  ;;  %863 = vmin.xlane.f32.xlu0 %v3518_v41 }
 0x198   : > { %v714_v49 = vpop.xlane.xlu0 %713  ;;  %v874_v54 = vshra.s32 %v3523_v52, 16 }
 0x199   : > { %vm773_vm5 = vcmp.eq.f32.partialorder %v3391_v59, %v714_v49  ;;  %v704_v31 = vpop.xlane.xlu1 %703 }
 0x19a   : > { %v3532_v30 = vsel %vm773_vm5, %v3507_v50, 128  ;;  %vm768_vm6 = vcmp.eq.f32.partialorder %v3394_v61, %v704_v31  ;;  %v1833_v57 = vsel %vm1831_vm3, %v704_v31, 0.0  ;;  %v3536_v29 = vcvt.s32.f32 %v874_v54 }
 0x19b   : > { %v3539_v26 = vsel %vm768_vm6, %v3507_v50, 128  ;;  %v1834_v25 = vadd.f32 %v1833_v57, %v1832_v32  ;;  %835 = vmin.xlane.f32.xlu0 %v3529_v63  ;;  %v916_v59 = vshra.s32 %v3532_v30, 16 }
 0x19c   : > { %4990 = vst [vmem:[#allocation18_spill] sm:$0xff] %v3536_v29  ;;  %v710_v44 = vpop.xlane.xlu0 %709  ;;  %877 = vmin.xlane.f32.xlu1 %v3536_v29  ;;  %v846_v24 = vshra.s32 %v3539_v26, 16 }
 0x19d   : > { %v1836_v61 = vadd.f32 %v1835_v60, %v1834_v25  ;;  %vm771_vm7 = vcmp.eq.f32.partialorder %v3399_v0, %v710_v44  ;;  %v716_v31 = vpop.xlane.xlu1 %715  ;;  %v3547_v54 = vcvt.s32.f32 %v916_v59  ;;  %v1839_v29 = vsel %vm1831_vm3, %v710_v44, 0.0 }
 0x19e   : > { %v3550_v32 = vcvt.s32.f32 %v846_v24  ;;  %v3553_v57 = vsel %vm771_vm7, %v3507_v50, 128  ;;  %vm774_vm12 = vcmp.eq.f32.partialorder %v3402_v1, %v716_v31 }
 0x19f   : > { %4991 = vst [vmem:[#allocation19_spill] sm:$0xff] %v3547_v54  ;;  %4993 = vst [vmem:[#allocation21_spill] sm:$0xff] %v3553_v57  ;;  %v1838_v20 = vadd.f32 %v1837_v23, %v1836_v61  ;;  %919 = vmin.xlane.f32.xlu0 %v3547_v54  ;;  %v888_v56 = vshra.s32 %v3553_v57, 16  ;;  %v1843_v61 = vsel %vm1831_vm3, %v714_v49, 0.0 }
 0x1a0   : > { %4992 = vst [vmem:[#allocation20_spill] sm:$0xff] %v3550_v32  ;;  %v722_v25 = vpop.xlane.xlu0 %721  ;;  %849 = vmin.xlane.f32.xlu1 %v3550_v32 }
 0x1a1   : > { %v1840_v0 = vadd.f32 %v1839_v29, %v1838_v20  ;;  %v712_v59 = vpop.xlane.xlu1 %711  ;;  %v3559_v60 = vcvt.s32.f32 %v888_v56  ;;  %v1845_v20 = vsel %vm1831_vm3, %v716_v31, 0.0  ;;  %v1851_v49 = vsel %vm1831_vm3, %v722_v25, 0.0 }
 0x1a2   : > { %vm772_vm8 = vcmp.eq.f32.partialorder %v3410_v15, %v712_v59  ;;  %v1841_v24 = vsel %vm1831_vm3, %v712_v59, 0.0  ;;  %vm777_vm14 = vcmp.eq.f32.partialorder %v3407_v9, %v722_v25  ;;  %v3613_v31 = vsel %vm774_vm12, %v3507_v50, 128 }
 0x1a3   : > { %4994 = vst [vmem:[#allocation22_spill] sm:$0xff] %v3559_v60  ;;  %v3564_v39 = vsel %vm772_vm8, %v3507_v50, 128  ;;  %v1842_v23 = vadd.f32 %v1841_v24, %v1840_v0  ;;  %891 = vmin.xlane.f32.xlu0 %v3559_v60  ;;  %4997 = vst [vmem:[#allocation25_spill] sm:$0xff] %v3613_v31  ;;  %v3618_v25 = vsel %vm777_vm14, %v3507_v50, 128 }
 0x1a4   : > { %4995 = vst [vmem:[#allocation23_spill] sm:$0xff] %v3564_v39  ;;  %v902_v44 = vshra.s32 %v3564_v39, 16  ;;  %v718_v32 = vpop.xlane.xlu0 %717  ;;  %4998 = vst [vmem:[#allocation26_spill] sm:$0xff] %v3618_v25 }
 0x1a5   : > { %v1844_v54 = vadd.f32 %v1843_v61, %v1842_v23  ;;  %v720_v15 = vpop.xlane.xlu1 %719  ;;  %v1847_v59 = vsel %vm1831_vm3, %v718_v32, 0.0  ;;  %vm775_vm10 = vcmp.eq.f32.partialorder %v3415_v22, %v718_v32 }
 0x1a6   : > { %v3570_v29 = vcvt.s32.f32 %v902_v44  ;;  %v1849_v0 = vsel %vm1831_vm3, %v720_v15, 0.0  ;;  %v3602_v22 = vsel %vm775_vm10, %v3507_v50, 128  ;;  %vm776_vm1 = vcmp.eq.f32.partialorder %v3418_v27, %v720_v15 }
 0x1a7   : > { %v1846_v56 = vadd.f32 %v1845_v20, %v1844_v54  ;;  %4996 = vst [vmem:[#allocation24_spill] sm:$0xff] %v3602_v22 }
 0x1a8   : > { %905 = vmin.xlane.f32.xlu1 %v3570_v29 }
 0x1a9   : > { %v1848_v57 = vadd.f32 %v1847_v59, %v1846_v56 }
 0x1ab   : > { %v1850_v24 = vadd.f32 %v1849_v0, %v1848_v57 }
 0x1ad   : > { %v1852_v60 = vadd.f32 %v1851_v49, %v1850_v24  ;;  %v944_v24 = vshra.s32 %v3602_v22, 16 }
 0x1af   : > { %v3643_v27 = vcvt.s32.f32 %v944_v24 }
 0x1b0   : > { %v3576_v39 = vpop.xlane.xlu0 %737 }
 0x1b1   : > { %vm785_vm9 = vcmp.eq.f32.partialorder %v3423_v37, %v3576_v39  ;;  %5002 = vst [vmem:[#allocation30_spill] sm:$0xff] %v3643_v27 }
 0x1b2   : > { %v3581_v23 = vsel %vm785_vm9, %v3507_v50, 128  ;;  %v3583_v54 = vpop.xlane.xlu1 %739 }
 0x1b3   : > { %vm786_vm11 = vcmp.eq.f32.partialorder %v3426_v40, %v3583_v54  ;;  %v1084_v57 = vshra.s32 %v3581_v23, 16 }
 0x1b4   : > { %v3590_v61 = vsel %vm786_vm11, %v3507_v50, 128  ;;  %v3592_v44 = vpop.xlane.xlu0 %733 }
 0x1b5   : > { %vm783_vm13 = vcmp.eq.f32.partialorder %v3430_v42, %v3592_v44  ;;  %v3597_v37 = vcvt.s32.f32 %v1084_v57  ;;  %v1098_v20 = vshra.s32 %v3590_v61, 16 }
 0x1b6   : > { %v3605_v40 = vsel %vm783_vm13, %v3507_v50, 128  ;;  %v724_v32 = vpop.xlane.xlu1 %723 }
 0x1b7   : > { %v1853_v56 = vsel %vm1831_vm3, %v724_v32, 0.0  ;;  %1087 = vmin.xlane.f32.xlu0 %v3597_v37  ;;  %v3609_v1 = vcvt.s32.f32 %v1098_v20  ;;  %v1056_v42 = vshra.s32 %v3605_v40, 16  ;;  %vm778_vm4 = vcmp.eq.f32.partialorder %v3434_v43, %v724_v32 }
 0x1b8   : > { %v1854_v59 = vadd.f32 %v1853_v56, %v1852_v60  ;;  %v3615_v9 = vpop.xlane.xlu0 %735  ;;  %v930_v56 = vshra.s32 %v3613_v31, 16 }
 0x1b9   : > { %vm784_vm15 = vcmp.eq.f32.partialorder %v3438_v45, %v3615_v9  ;;  %1101 = vmin.xlane.f32.xlu1 %v3609_v1  ;;  %v3623_v0 = vcvt.s32.f32 %v1056_v42  ;;  %v972_v45 = vshra.s32 %v3618_v25, 16  ;;  %v3639_v42 = vsel %vm776_vm1, %v3507_v50, 128 }
 0x1ba   : > { %v3628_v49 = vsel %vm784_vm15, %v3507_v50, 128  ;;  %5001 = vst [vmem:[#allocation29_spill] sm:$0xff] %v3639_v42  ;;  %v958_v24 = vshra.s32 %v3639_v42, 16 }
 0x1bb   : > { %4999 = vst [vmem:[#allocation27_spill] sm:$0xff] %v3623_v0  ;;  %5000 = vst [vmem:[#allocation28_spill] sm:$0xff] %v3628_v49  ;;  %v3630_v60 = vpop.xlane.xlu1 %743  ;;  %1059 = vmin.xlane.f32.xlu0 %v3623_v0  ;;  %v1070_v57 = vshra.s32 %v3628_v49, 16  ;;  %v3657_v25 = vcvt.s32.f32 %v972_v45 }
 0x1bc   : > { %v3634_v20 = vpop.xlane.xlu0 %745  ;;  %vm788_vm5 = vcmp.eq.f32.partialorder %v3446_v51, %v3630_v60  ;;  %v3680_v42 = vcvt.s32.f32 %v958_v24 }
 0x1bd   : > { %vm789_vm2 = vcmp.eq.f32.partialorder %v3442_v48, %v3634_v20  ;;  %v3645_v15 = vcvt.s32.f32 %v1070_v57  ;;  %5005 = vst [vmem:[#allocation33_spill] sm:$0xff] %v3657_v25  ;;  %v3659_v48 = vcvt.s32.f32 %v930_v56  ;;  %v3663_v57 = vsel %vm778_vm4, %v3507_v50, 128 }
 0x1be   : > { %v3649_v0 = vsel %vm789_vm2, %v3507_v50, 128  ;;  %5007 = vst [vmem:[#allocation35_spill] sm:$0xff] %v3663_v57  ;;  %v3676_v56 = vsel %vm788_vm5, %v3507_v50, 128  ;;  %5009 = vst [vmem:[#allocation37_spill] sm:$0xff] %v3680_v42 }
 0x1bf   : > { %5003 = vst [vmem:[#allocation31_spill] sm:$0xff] %v3645_v15  ;;  %5004 = vst [vmem:[#allocation32_spill] sm:$0xff] %v3649_v0  ;;  %v3651_v49 = vpop.xlane.xlu1 %747  ;;  %947 = vmin.xlane.f32.xlu0 %v3643_v27  ;;  %1073 = vmin.xlane.f32.xlu1 %v3645_v15  ;;  %v1140_v43 = vshra.s32 %v3649_v0, 16 }
 0x1c0   : > { %v3655_v31 = vpop.xlane.xlu0 %741  ;;  %5006 = vst [vmem:[#allocation34_spill] sm:$0xff] %v3659_v48  ;;  %vm790_vm7 = vcmp.eq.f32.partialorder %v3449_v53, %v3651_v49 }
 0x1c1   : > { %vm787_vm6 = vcmp.eq.f32.partialorder %v3453_v55, %v3655_v31  ;;  %v986_v55 = vshra.s32 %v3663_v57, 16  ;;  %v3685_v15 = vcvt.s32.f32 %v1140_v43  ;;  %v3695_v24 = vsel %vm790_vm7, %v3507_v50, 128 }
 0x1c2   : > { %v3671_v32 = vsel %vm787_vm6, %v3507_v50, 128  ;;  %5011 = vst [vmem:[#allocation39_spill] sm:$0xff] %v3695_v24  ;;  %v1126_v57 = vshra.s32 %v3676_v56, 16 }
 0x1c3   : > { %5008 = vst [vmem:[#allocation36_spill] sm:$0xff] %v3671_v32  ;;  %v728_v45 = vpop.xlane.xlu1 %727  ;;  %975 = vmin.xlane.f32.xlu0 %v3657_v25  ;;  %933 = vmin.xlane.f32.xlu1 %v3659_v48  ;;  %5010 = vst [vmem:[#allocation38_spill] sm:$0xff] %v3685_v15  ;;  %v1112_v25 = vshra.s32 %v3671_v32, 16  ;;  %v3697_v43 = vcvt.s32.f32 %v986_v55 }
 0x1c4   : > { %v726_v51 = vpop.xlane.xlu0 %725  ;;  %v1857_v22 = vsel %vm1831_vm3, %v728_v45, 0.0  ;;  %vm780_vm10 = vcmp.eq.f32.partialorder %v3462_v5, %v728_v45  ;;  %v1154_v5 = vshra.s32 %v3695_v24, 16 }
 0x1c5   : > { %vm779_vm8 = vcmp.eq.f32.partialorder %v3465_v10, %v726_v51  ;;  %v1855_v0 = vsel %vm1831_vm3, %v726_v51, 0.0  ;;  %5012 = vst [vmem:[#allocation40_spill] sm:$0xff] %v3697_v43  ;;  %v3720_v45 = vsel %vm780_vm10, %v3507_v50, 128 }
 0x1c6   : > { %v3689_v48 = vsel %vm779_vm8, %v3507_v50, 128  ;;  %v1856_v27 = vadd.f32 %v1855_v0, %v1854_v59  ;;  %v3702_v0 = vcvt.s32.f32 %v1112_v25  ;;  %5013 = vst [vmem:[#allocation41_spill] sm:$0xff] %v3720_v45  ;;  %v3738_v24 = vcvt.s32.f32 %v1154_v5 }
 0x1c7   : > { %v732_v53 = vpop.xlane.xlu1 %731  ;;  %1143 = vmin.xlane.f32.xlu0 %v3685_v15  ;;  %961 = vmin.xlane.f32.xlu1 %v3680_v42  ;;  %v1000_v32 = vshra.s32 %v3689_v48, 16 }
 0x1c8   : > { %v730_v10 = vpop.xlane.xlu0 %729  ;;  %v1858_v51 = vadd.f32 %v1857_v22, %v1856_v27  ;;  %v1861_v22 = vsel %vm1831_vm3, %v732_v53, 0.0  ;;  %vm782_vm12 = vcmp.eq.f32.partialorder %v3470_v16, %v732_v53  ;;  %5014 = vst [vmem:[#allocation42_spill] sm:$0xff] %v3738_v24  ;;  %v1014_v16 = vshra.s32 %v3720_v45, 16 }
 0x1c9   : > { %vm781_vm9 = vcmp.eq.f32.partialorder %v3473_v36, %v730_v10  ;;  %v1859_v59 = vsel %vm1831_vm3, %v730_v10, 0.0  ;;  %v1863_v36 = vsel %vm1831_vm3, %v3592_v44, 0.0  ;;  %v3716_v10 = vcvt.s32.f32 %v1126_v57 }
 0x1ca   : > { %v3707_v42 = vsel %vm781_vm9, %v3507_v50, 128  ;;  %v1860_v15 = vadd.f32 %v1859_v59, %v1858_v51  ;;  %v3723_v51 = vcvt.s32.f32 %v1000_v32  ;;  %v3742_v53 = vsel %vm782_vm12, %v3507_v50, 128 }
 0x1cb   : > { %v3710_v27 = vpop.xlane.xlu1 %751  ;;  %1115 = vmin.xlane.f32.xlu0 %v3702_v0  ;;  %989 = vmin.xlane.f32.xlu1 %v3697_v43  ;;  %v1028_v59 = vshra.s32 %v3707_v42, 16 }
 0x1cc   : > { %v1862_v25 = vadd.f32 %v1861_v22, %v1860_v15  ;;  %v750_v55 = vpop.xlane.xlu0 %749  ;;  %v1865_v15 = vsel %vm1831_vm3, %v3615_v9, 0.0  ;;  %vm792_vm14 = vcmp.eq.f32.partialorder %v3480_v33, %v3710_v27 }
 0x1cd   : > { %vm791_vm11 = vcmp.eq.f32.partialorder %v3486_v34, %v750_v55  ;;  %v1867_v34 = vsel %vm1831_vm3, %v3576_v39, 0.0  ;;  %v3745_v9 = vcvt.s32.f32 %v1028_v59  ;;  %v3767_v33 = vsel %vm792_vm14, %v3507_v50, 128 }
 0x1ce   : > { %v1864_v43 = vadd.f32 %v1863_v36, %v1862_v25  ;;  %v3728_v44 = vsel %vm791_vm11, %v3507_v50, 128 }
 0x1cf   : > { %1003 = vmin.xlane.f32.xlu0 %v3723_v51  ;;  %1129 = vmin.xlane.f32.xlu1 %v3716_v10  ;;  %v3736_v32 = vpop.xlane.xlu1 %755  ;;  %5015 = vst [vmem:[#allocation43_spill] sm:$0xff] %v3745_v9  ;;  %v1168_v36 = vshra.s32 %v3728_v44, 16 }
 0x1d0   : > { %v1866_v57 = vadd.f32 %v1865_v15, %v1864_v43  ;;  %v754_v22 = vpop.xlane.xlu0 %753  ;;  %v1869_v43 = vsel %vm1831_vm3, %v3583_v54, 0.0  ;;  %v1042_v15 = vshra.s32 %v3742_v53, 16  ;;  %vm794_vm1 = vcmp.eq.f32.partialorder %v3496_v47, %v3736_v32 }
 0x1d1   : > { %vm793_vm13 = vcmp.eq.f32.partialorder %v3457_v58, %v754_v22  ;;  %v1871_v58 = vsel %vm1831_vm3, %v3655_v31, 0.0  ;;  %v1873_v31 = vsel %vm1831_vm3, %v3630_v60, 0.0  ;;  %v1182_v47 = vshra.s32 %v3767_v33, 16 }
 0x1d2   : > { %v1868_v25 = vadd.f32 %v1867_v34, %v1866_v57  ;;  %v3749_v39 = vsel %vm793_vm13, %v3507_v50, 128  ;;  %v3761_v34 = vcvt.s32.f32 %v1168_v36  ;;  %v3763_v57 = vcvt.s32.f32 %v1014_v16 }
 0x1d3   : > { %1031 = vmin.xlane.f32.xlu0 %v3745_v9  ;;  %1157 = vmin.xlane.f32.xlu1 %v3738_v24  ;;  %v1196_v54 = vshra.s32 %v3749_v39, 16  ;;  %v760_v24 = vpop.xlane.xlu1 %759 }
 0x1d4   : > { %v1870_v5 = vadd.f32 %v1869_v43, %v1868_v25  ;;  %v758_v59 = vpop.xlane.xlu0 %757  ;;  %v3782_v25 = vcvt.s32.f32 %v1042_v15  ;;  %vm796_vm4 = vcmp.eq.f32.partialorder %v3493_v46, %v760_v24  ;;  %v1879_v15 = vsel %vm1831_vm3, %v750_v55, 0.0 }
 0x1d5   : > { %vm795_vm15 = vcmp.eq.f32.partialorder %v3483_v35, %v758_v59  ;;  %v1875_v35 = vsel %vm1831_vm3, %v3634_v20, 0.0  ;;  %v3786_v43 = vcvt.s32.f32 %v1196_v54  ;;  %v3811_v46 = vsel %vm796_vm4, %v3507_v50, 128 }
 0x1d6   : > { %v1872_v9 = vadd.f32 %v1871_v58, %v1870_v5  ;;  %v3770_v45 = vsel %vm795_vm15, %v3507_v50, 128  ;;  %5017 = vst [vmem:[#allocation45_spill] sm:$0xff] %v3782_v25  ;;  %v3791_v5 = vsel %vm794_vm1, %v3507_v50, 128 }
 0x1d7   : > { %1171 = vmin.xlane.f32.xlu0 %v3761_v34  ;;  %1017 = vmin.xlane.f32.xlu1 %v3763_v57  ;;  %v1224_v60 = vshra.s32 %v3770_v45, 16  ;;  %v3802_v54 = vpop.xlane.xlu1 %763 }
 0x1d8   : > { %v1874_v16 = vadd.f32 %v1873_v31, %v1872_v9  ;;  %v3780_v36 = vpop.xlane.xlu0 %761  ;;  %v1877_v9 = vsel %vm1831_vm3, %v3651_v49, 0.0  ;;  %vm798_vm5 = vcmp.eq.f32.partialorder %v3490_v28, %v3802_v54  ;;  %v1885_v28 = vsel %vm1831_vm3, %v3736_v32, 0.0 }
 0x1d9   : > { %5016 = vst [vmem:[#allocation44_spill] sm:$0xff] %v3780_v36  ;;  %vm797_vm2 = vcmp.eq.f32.partialorder %v3476_v38, %v3780_v36  ;;  %v3804_v31 = vcvt.s32.f32 %v1224_v60  ;;  %v1210_v36 = vshra.s32 %v3791_v5, 16  ;;  %v1883_v60 = vsel %vm1831_vm3, %v754_v22, 0.0 }
 0x1da   : > { %v1876_v58 = vadd.f32 %v1875_v35, %v1874_v16  ;;  %v3794_v20 = vsel %vm797_vm2, %v3507_v50, 128  ;;  %v3806_v35 = vcvt.s32.f32 %v1182_v47  ;;  %v1887_v22 = vsel %vm1831_vm3, %v758_v59, 0.0 }
 0x1db   : > { %1199 = vmin.xlane.f32.xlu0 %v3786_v43  ;;  %1045 = vmin.xlane.f32.xlu1 %v3782_v25  ;;  %v1252_v16 = vshra.s32 %v3794_v20, 16  ;;  %v1881_v25 = vsel %vm1831_vm3, %v3710_v27, 0.0  ;;  %v1727_v32 = vmul.f32 %v3260_v2, %v3260_v2  ;;  %v1728_v59 = vmul.f32 %v3263_v3, %v3263_v3 }
 0x1dc   : > { %v1878_v38 = vadd.f32 %v1877_v9, %v1876_v58  ;;  %v3822_v58 = vcvt.s32.f32 %v1210_v36  ;;  %v1238_v9 = vshra.s32 %v3811_v46, 16  ;;  %v1731_v2 = vmul.f32 %v3274_v7, %v3274_v7 }
 0x1dd   : > { %v3820_v47 = vcvt.s32.f32 %v1252_v16 }
 0x1de   : > { %v1880_v49 = vadd.f32 %v1879_v15, %v1878_v38  ;;  %v3826_v15 = vsel %vm798_vm5, %v3507_v50, 128 }
 0x1df   : > { %1227 = vmin.xlane.f32.xlu0 %v3804_v31  ;;  %1185 = vmin.xlane.f32.xlu1 %v3806_v35  ;;  %v1266_v36 = vshra.s32 %v3826_v15, 16 }
 0x1e0   : > { %v1882_v55 = vadd.f32 %v1881_v25, %v1880_v49  ;;  %v3833_v25 = vcvt.s32.f32 %v1238_v9  ;;  %v1889_v49 = vsel %vm1831_vm3, %v760_v24, 0.0  ;;  %v1759_v9 = vsel %vm4968_vm0, %v1727_v32, 0.0 }
 0x1e1   : > { %v1729_v24 = vmul.f32 %v3266_v4, %v3266_v4  ;;  %v1766_v32 = vsel %vm4968_vm0, %v1731_v2, 0.0  ;;  %v859_v2 = vand.u32 65535, %v3511_v62 }
 0x1e2   : > { %v1884_v38 = vadd.f32 %v1883_v60, %v1882_v55  ;;  %v3840_v60 = vcvt.s32.f32 %v1266_v36 }
 0x1e3   : > { %1255 = vmin.xlane.f32.xlu0 %v3820_v47  ;;  %1213 = vmin.xlane.f32.xlu1 %v3822_v58 }
 0x1e4   : > { %v1886_v27 = vadd.f32 %v1885_v28, %v1884_v38  ;;  %v1760_v38 = vsel %vm4968_vm0, %v1728_v59, 0.0 }
 0x1e5   : > { %v1761_v28 = vadd.f32 %v1760_v38, %v1759_v9  ;;  %v1734_v38 = vmul.f32 %v3290_v12, %v3290_v12  ;;  %v1737_v12 = vmul.f32 %v3305_v17, %v3305_v17 }
 0x1e6   : > { %v1888_v16 = vadd.f32 %v1887_v22, %v1886_v27  ;;  %v1730_v27 = vmul.f32 %v3271_v6, %v3271_v6  ;;  %v1762_v22 = vsel %vm4968_vm0, %v1729_v24, 0.0  ;;  %v1733_v6 = vmul.f32 %v3287_v11, %v3287_v11 }
 0x1e7   : > { %1241 = vmin.xlane.f32.xlu1 %v3833_v25  ;;  %v1763_v36 = vadd.f32 %v1762_v22, %v1761_v28  ;;  %v1772_v7 = vsel %vm4968_vm0, %v1734_v38, 0.0  ;;  %v1736_v22 = vmul.f32 %v3296_v14, %v3296_v14  ;;  %v831_v14 = vand.u32 65535, %v3516_v21 }
 0x1e8   : > { %v3838_v55 = vadd.f32 %v1889_v49, %v1888_v16  ;;  %v1764_v16 = vsel %vm4968_vm0, %v1730_v27, 0.0  ;;  %v1732_v49 = vmul.f32 %v3277_v8, %v3277_v8  ;;  %v1770_v24 = vsel %vm4968_vm0, %v1733_v6, 0.0 }
 0x1e9   : > { %v1765_v3 = vadd.f32 %v1764_v16, %v1763_v36  ;;  %v1735_v8 = vmul.f32 %v3293_v13, %v3293_v13  ;;  %v1776_v11 = vsel %vm4968_vm0, %v1736_v22, 0.0  ;;  %v1778_v13 = vsel %vm4968_vm0, %v1737_v12, 0.0 }
 0x1ea   : > { %v1768_v4 = vsel %vm4968_vm0, %v1732_v49, 0.0  ;;  %v1738_v49 = vmul.f32 %v3308_v18, %v3308_v18  ;;  %v1739_v18 = vmul.f32 %v3311_v19, %v3311_v19  ;;  %v833_v38 = vcvt.s32.f32 %v831_v14 }
 0x1eb   : > { %1269 = vmin.xlane.f32.xlu1 %v3840_v60  ;;  %v1767_v59 = vadd.f32 %v1766_v32, %v1765_v3  ;;  %v1774_v36 = vsel %vm4968_vm0, %v1735_v8, 0.0 }
 0x1ec   : > { %v1780_v62 = vsel %vm4968_vm0, %v1738_v49, 0.0  ;;  %v5022_v49 = vld [vmem:[#allocation20_spill] sm:$0xff] }
 0x1ed   : > { %v1769_v9 = vadd.f32 %v1768_v4, %v1767_v59  ;;  %v861_v59 = vcvt.s32.f32 %v859_v2  ;;  %v873_v4 = vand.u32 65535, %v3523_v52 }
 0x1ef   : > { %v1771_v28 = vadd.f32 %v1770_v24, %v1769_v9  ;;  %v915_v24 = vand.u32 65535, %v3532_v30  ;;  %v875_v21 = vcvt.s32.f32 %v873_v4  ;;  %v1782_v30 = vsel %vm4968_vm0, %v1739_v18, 0.0  ;;  %v5023_v4 = vld [vmem:[#allocation10_spill] sm:$0xff]  ;;  %v416_v18 = vld [vmem:[%s5024_s2] sm:$0xff] }
 0x1f1   : > { %v1773_v27 = vadd.f32 %v1772_v7, %v1771_v28  ;;  %v5018_v7 = vld [vmem:[#allocation18_spill] sm:$0xff] }
 0x1f3   : > { %v1775_v16 = vadd.f32 %v1774_v36, %v1773_v27  ;;  %v5019_v27 = vld [vmem:[#allocation9_spill] sm:$0xff] }
 0x1f4   : > { %v1740_v22 = vmul.f32 %v5019_v27, %v5019_v27 }
 0x1f5   : > { %v1777_v3 = vadd.f32 %v1776_v11, %v1775_v16  ;;  %v917_v16 = vcvt.s32.f32 %v915_v24  ;;  %v5025_v24 = vld [vmem:[#allocation22_spill] sm:$0xff] }
 0x1f6   : > { %v1784_v14 = vsel %vm4968_vm0, %v1740_v22, 0.0 }
 0x1f7   : > { %v1779_v17 = vadd.f32 %v1778_v13, %v1777_v3 }
 0x1f9   : > { %v1781_v8 = vadd.f32 %v1780_v62, %v1779_v17 }
 0x1fb   : > { %v1783_v13 = vadd.f32 %v1782_v30, %v1781_v8 }
 0x1fd   : > { %v1785_v8 = vadd.f32 %v1784_v14, %v1783_v13  ;;  %v418_v13 = vld [vmem:[%s5024_s2 + $0x10] sm:$0xff]  ;;  %v5030_v14 = vld [vmem:[#allocation13_spill] sm:$0xff] }
 0x224   : > { %v3879_v32 = vpop.xlane.xlu0 %863 }
 0x225   : > { %vm865_vm6 = vcmp.eq.f32.partialorder %v3518_v41, %v3879_v32  ;;  %v845_v41 = vand.u32 65535, %v3539_v26  ;;  %v5021_v26 = vld [vmem:[#allocation19_spill] sm:$0xff] }
 0x226   : > { %v866_v6 = vsel %vm865_vm6, %v861_v59, inf }
 0x227   : > { %867 = vmin.xlane.f32.xlu0 %v866_v6  ;;  %v847_v2 = vcvt.s32.f32 %v845_v41  ;;  %v1741_v6 = vmul.f32 %v5023_v4, %v5023_v4 }
 0x228   : > { %v3888_v9 = vpop.xlane.xlu0 %835 }
 0x229   : > { %v3891_v28 = vpop.xlane.xlu1 %877  ;;  %vm837_vm7 = vcmp.eq.f32.partialorder %v3529_v63, %v3888_v9  ;;  %v5020_v63 = vld [vmem:[#allocation21_spill] sm:$0xff]  ;;  %v1786_v22 = vsel %vm4968_vm0, %v1741_v6, 0.0 }
 0x22a   : > { %v838_v52 = vsel %vm837_vm7, %v833_v38, inf  ;;  %vm879_vm8 = vcmp.eq.f32.partialorder %v5018_v7, %v3891_v28  ;;  %v887_v11 = vand.u32 65535, %v5020_v63  ;;  %v417_v38 = vld [vmem:[%s5024_s2 + $0x8] sm:$0xff]  ;;  %v1787_v63 = vadd.f32 %v1786_v22, %v1785_v8  ;;  %v5033_v8 = vld [vmem:[#allocation15_spill] sm:$0xff] }
 0x22b   : > { %839 = vmin.xlane.f32.xlu0 %v838_v52  ;;  %v880_v19 = vsel %vm879_vm8, %v875_v21, inf  ;;  %v5026_v21 = vld [vmem:[#allocation23_spill] sm:$0xff]  ;;  %v3924_v52 = vpack.c.bf16 %v417_v38, %v416_v18  ;;  %v5032_v38 = vld [vmem:[#allocation14_spill] sm:$0xff] }
 0x22c   : > { %v3901_v36 = vpop.xlane.xlu0 %919  ;;  %881 = vmin.xlane.f32.xlu1 %v880_v19  ;;  %v889_v62 = vcvt.s32.f32 %v887_v11  ;;  %v901_v41 = vand.u32 65535, %v5026_v21  ;;  %v5028_v19 = vld [vmem:[#allocation11_spill] sm:$0xff]  ;;  %v1083_v21 = vand.u32 65535, %v3581_v23 }
 0x22d   : > { %v3904_v12 = vpop.xlane.xlu1 %849  ;;  %vm921_vm9 = vcmp.eq.f32.partialorder %v5021_v26, %v3901_v36  ;;  %5027 = vst [vmem:[#allocation18_spill] sm:$0xff] %v3924_v52  ;;  %2777 = vmatprep.subr.bf16.mxu0 %v3924_v52  ;;  %v1742_v27 = vmul.f32 %v5028_v19, %v5028_v19  ;;  %v1746_v19 = vmul.f32 %v5033_v8, %v5033_v8 }
 0x22e   : > { %v922_v3 = vsel %vm921_vm9, %v917_v16, inf  ;;  %vm851_vm10 = vcmp.eq.f32.partialorder %v5022_v49, %v3904_v12  ;;  %2779 = vmatpush3.bf16.xpose.msra.mxu0 %v3924_v52  ;;  %v903_v16 = vcvt.s32.f32 %v901_v41  ;;  %v1097_v41 = vand.u32 65535, %v3590_v61 }
 0x22f   : > { %923 = vmin.xlane.f32.xlu0 %v922_v3  ;;  %v852_v59 = vsel %vm851_vm10, %v847_v2, inf  ;;  %v1788_v26 = vsel %vm4968_vm0, %v1742_v27, 0.0  ;;  %v5029_v2 = vld [vmem:[#allocation12_spill] sm:$0xff]  ;;  %v1796_v61 = vsel %vm4968_vm0, %v1746_v19, 0.0 }
 0x230   : > { %v3913_v17 = vpop.xlane.xlu0 %891  ;;  %853 = vmin.xlane.f32.xlu1 %v852_v59  ;;  %v1743_v3 = vmul.f32 %v5029_v2, %v5029_v2  ;;  %v1789_v49 = vadd.f32 %v1788_v26, %v1787_v63  ;;  %v419_v59 = vld [vmem:[%s5024_s2 + $0x18] sm:$0xff]  ;;  %v1055_v63 = vand.u32 65535, %v3605_v40  ;;  %v1099_v23 = vcvt.s32.f32 %v1097_v41  ;;  %s2165_s2 = sshll.u32 %s4169_s14, 4  ;;  %s2166_s2 = int_to_ptr.vmem [resolvable:$true] %s2165_s2 }
 0x231   : > { %vm893_vm11 = vcmp.eq.f32.partialorder %v5025_v24, %v3913_v17  ;;  %v3947_v6 = vpack.c.bf16 %v419_v59, %v418_v13  ;;  %v1745_v24 = vmul.f32 %v5032_v38, %v5032_v38  ;;  %s2985_s6 = scalar_lea.vmem %s2166_s2, 16 }
 0x232   : > { %v894_v7 = vsel %vm893_vm11, %v889_v62, inf  ;;  %v1790_v4 = vsel %vm4968_vm0, %v1743_v3, 0.0  ;;  %v5034_v3 = vld [vmem:[#allocation16_spill] sm:$0xff]  ;;  %v1057_v59 = vcvt.s32.f32 %v1055_v63  ;;  %v5040_v63 = vld [vmem:[#allocation25_spill] sm:$0xff]  ;;  %p2986_p13 = scmp.ne.s32.totalorder %s2166_s2, %s2985_s6 }
 0x233   : > { %895 = vmin.xlane.f32.xlu0 %v894_v7  ;;  %5031 = vst [vmem:[#allocation9_spill] sm:$0xff] %v3947_v6  ;;  %2781 = vmatprep.subr.bf16.mxu0 %v3947_v6  ;;  %v1791_v62 = vadd.f32 %v1790_v4, %v1789_v49  ;;  %v1794_v27 = vsel %vm4968_vm0, %v1745_v24, 0.0  ;;  %v1747_v49 = vmul.f32 %v5034_v3, %v5034_v3  ;;  %v5038_v24 = vld [vmem:[#allocation17_spill] sm:$0xff] }
 0x234   : > { %p2987_p0 = pnand %p2986_p13, %p3221_p4 }
 0x235   : > { %v3931_v30 = vpop.xlane.xlu1 %905 }
 0x236   : > { %vm907_vm12 = vcmp.eq.f32.partialorder %v3570_v29, %v3931_v30  ;;  %v1744_v29 = vmul.f32 %v5030_v14, %v5030_v14  ;;  %2783 = vmatpush3.bf16.xpose.msra.mxu0 %v3947_v6  ;;  %v5035_v14 = vld [vmem:[#allocation24_spill] sm:$0xff]  ;;  %p2988_p1 = pneg %p2987_p0 }
 0x237   : > { %v908_v11 = vsel %vm907_vm12, %v903_v16, inf  ;;  %v1085_v16 = vcvt.s32.f32 %v1083_v21  ;;  %v1748_v21 = vmul.f32 %v5038_v24, %v5038_v24  ;;  %v4024_v6 = vld [vmem:[%s3257_s16 + $0xc0] sm:$0xff] }
 0x238   : > { %909 = vmin.xlane.f32.xlu1 %v908_v11  ;;  %v1792_v18 = vsel %vm4968_vm0, %v1744_v29, 0.0  ;;  %v5036_v29 = vld [vmem:[#allocation28_spill] sm:$0xff] }
 0x239   : > { %v1793_v7 = vadd.f32 %v1792_v18, %v1791_v62  ;;  %v1069_v4 = vand.u32 65535, %v5036_v29  ;;  %v5037_v62 = vld [vmem:[#allocation27_spill] sm:$0xff] }
 0x23b   : > { %v1795_v2 = vadd.f32 %v1794_v27, %v1793_v7  ;;  %v1071_v19 = vcvt.s32.f32 %v1069_v4  ;;  %v5039_v27 = vld [vmem:[#allocation26_spill] sm:$0xff] }
 0x23d   : > { %v1797_v38 = vadd.f32 %v1796_v61, %v1795_v2  ;;  %v5042_v2 = vld [vmem:[#allocation31_spill] sm:$0xff] }
 0x244   : > { %v3959_v22 = vpop.xlane.xlu0 %1087 }
 0x245   : > { %vm1089_vm13 = vcmp.eq.f32.partialorder %v3597_v37, %v3959_v22  ;;  %v943_v37 = vand.u32 65535, %v5035_v14 }
 0x246   : > { %v3964_v11 = vpop.xlane.xlu1 %1101  ;;  %v1090_v26 = vsel %vm1089_vm13, %v1085_v16, inf  ;;  %v971_v16 = vand.u32 65535, %v5039_v27 }
 0x247   : > { %1091 = vmin.xlane.f32.xlu0 %v1090_v26  ;;  %vm1103_vm14 = vcmp.eq.f32.partialorder %v3609_v1, %v3964_v11  ;;  %v1798_v1 = vsel %vm4968_vm0, %v1747_v49, 0.0  ;;  %v945_v8 = vcvt.s32.f32 %v943_v37  ;;  %v929_v26 = vand.u32 65535, %v5040_v63 }
 0x248   : > { %v3971_v13 = vpop.xlane.xlu0 %1059  ;;  %v1104_v40 = vsel %vm1103_vm14, %v1099_v23, inf  ;;  %v5041_v23 = vld [vmem:[#allocation30_spill] sm:$0xff]  ;;  %v1799_v49 = vadd.f32 %v1798_v1, %v1797_v38  ;;  %v973_v4 = vcvt.s32.f32 %v971_v16 }
 0x249   : > { %1105 = vmin.xlane.f32.xlu1 %v1104_v40  ;;  %vm1061_vm15 = vcmp.eq.f32.partialorder %v5037_v62, %v3971_v13  ;;  %v1800_v40 = vsel %vm4968_vm0, %v1748_v21, 0.0  ;;  %v931_v62 = vcvt.s32.f32 %v929_v26  ;;  %v5045_v21 = vld [vmem:[#allocation33_spill] sm:$0xff]  ;;  %v5046_v1 = vld [vmem:[#allocation34_spill] sm:$0xff] }
 0x24a   : > { %v1062_v18 = vsel %vm1061_vm15, %v1057_v59, inf  ;;  %v3992_v59 = vld [vmem:[%s3257_s16 + $0xb0] sm:$0xff]  ;;  %v1801_v63 = vadd.f32 %v1800_v40, %v1799_v49 }
 0x24b   : > { %1063 = vmin.xlane.f32.xlu0 %v1062_v18  ;;  %v1749_v14 = vmul.f32 %v3992_v59, %v3992_v59  ;;  %v5043_v18 = vld [vmem:[#allocation32_spill] sm:$0xff]  ;;  %v5049_v40 = vld [vmem:[#allocation38_spill] sm:$0xff] }
 0x24c   : > { %v3980_v41 = vpop.xlane.xlu0 %947  ;;  %v3982_v7 = vpop.xlane.xlu1 %1073  ;;  %v1139_v24 = vand.u32 65535, %v5043_v18 }
 0x24d   : > { %vm949_vm1 = vcmp.eq.f32.partialorder %v5041_v23, %v3980_v41  ;;  %vm1075_vm2 = vcmp.eq.f32.partialorder %v5042_v2, %v3982_v7  ;;  %v4007_v23 = vld [vmem:[%s3257_s16 + $0xb8] sm:$0xff]  ;;  %v1802_v16 = vsel %vm4968_vm0, %v1749_v14, 0.0 }
 0x24e   : > { %v950_v61 = vsel %vm949_vm1, %v945_v8, inf  ;;  %v1076_v3 = vsel %vm1075_vm2, %v1071_v19, inf  ;;  %v5044_v8 = vld [vmem:[#allocation29_spill] sm:$0xff]  ;;  %v1750_v2 = vmul.f32 %v4007_v23, %v4007_v23 }
 0x24f   : > { %951 = vmin.xlane.f32.xlu0 %v950_v61  ;;  %1077 = vmin.xlane.f32.xlu1 %v1076_v3  ;;  %v957_v38 = vand.u32 65535, %v5044_v8  ;;  %v1141_v3 = vcvt.s32.f32 %v1139_v24  ;;  %v5047_v8 = vld [vmem:[#allocation36_spill] sm:$0xff]  ;;  %v1751_v24 = vmul.f32 %v4024_v6, %v4024_v6 }
 0x250   : > { %v3996_v37 = vpop.xlane.xlu0 %975  ;;  %v3998_v29 = vpop.xlane.xlu1 %933 }
 0x251   : > { %vm977_vm4 = vcmp.eq.f32.partialorder %v5045_v21, %v3996_v37  ;;  %vm935_vm5 = vcmp.eq.f32.partialorder %v5046_v1, %v3998_v29  ;;  %v959_v18 = vcvt.s32.f32 %v957_v38  ;;  %v5050_v21 = vld [vmem:[#allocation37_spill] sm:$0xff] }
 0x252   : > { %v978_v19 = vsel %vm977_vm4, %v973_v4, inf  ;;  %v936_v27 = vsel %vm935_vm5, %v931_v62, inf  ;;  %v1111_v4 = vand.u32 65535, %v5047_v8  ;;  %v5048_v62 = vld [vmem:[#allocation35_spill] sm:$0xff] }
 0x253   : > { %979 = vmin.xlane.f32.xlu0 %v978_v19  ;;  %937 = vmin.xlane.f32.xlu1 %v936_v27  ;;  %v985_v49 = vand.u32 65535, %v5048_v62  ;;  %v1803_v19 = vadd.f32 %v1802_v16, %v1801_v63  ;;  %v1804_v27 = vsel %vm4968_vm0, %v1750_v2, 0.0  ;;  %v1125_v63 = vand.u32 65535, %v3676_v56  ;;  %v5051_v2 = vld [vmem:[#allocation40_spill] sm:$0xff] }
 0x254   : > { %v4012_v26 = vpop.xlane.xlu0 %1143  ;;  %v4014_v61 = vpop.xlane.xlu1 %961  ;;  %v1113_v62 = vcvt.s32.f32 %v1111_v4  ;;  %v1806_v4 = vsel %vm4968_vm0, %v1751_v24, 0.0 }
 0x255   : > { %vm1145_vm6 = vcmp.eq.f32.partialorder %v5049_v40, %v4012_v26  ;;  %vm963_vm7 = vcmp.eq.f32.partialorder %v5050_v21, %v4014_v61  ;;  %v987_v40 = vcvt.s32.f32 %v985_v49  ;;  %v1805_v21 = vadd.f32 %v1804_v27, %v1803_v19 }
 0x256   : > { %v1146_v1 = vsel %vm1145_vm6, %v1141_v3, inf  ;;  %v964_v14 = vsel %vm963_vm7, %v959_v18, inf  ;;  %v999_v3 = vand.u32 65535, %v3689_v48  ;;  %v1127_v49 = vcvt.s32.f32 %v1125_v63 }
 0x257   : > { %1147 = vmin.xlane.f32.xlu0 %v1146_v1  ;;  %965 = vmin.xlane.f32.xlu1 %v964_v14  ;;  %v4039_v1 = vld [vmem:[%s3257_s16 + $0xc8] sm:$0xff] }
 0x258   : > { %v4028_v38 = vpop.xlane.xlu0 %1115  ;;  %v4030_v8 = vpop.xlane.xlu1 %989  ;;  %v1752_v14 = vmul.f32 %v4039_v1, %v4039_v1 }
 0x259   : > { %vm1117_vm8 = vcmp.eq.f32.partialorder %v3702_v0, %v4028_v38  ;;  %vm991_vm9 = vcmp.eq.f32.partialorder %v5051_v2, %v4030_v8  ;;  %v1001_v0 = vcvt.s32.f32 %v999_v3  ;;  %v1807_v2 = vadd.f32 %v1806_v4, %v1805_v21  ;;  %v5055_v4 = vld [vmem:[#allocation43_spill] sm:$0xff] }
 0x25a   : > { %v1118_v16 = vsel %vm1117_vm8, %v1113_v62, inf  ;;  %v992_v18 = vsel %vm991_vm9, %v987_v40, inf  ;;  %v1027_v62 = vand.u32 65535, %v3707_v42  ;;  %v5052_v40 = vld [vmem:[#allocation39_spill] sm:$0xff] }
 0x25b   : > { %1119 = vmin.xlane.f32.xlu0 %v1118_v16  ;;  %993 = vmin.xlane.f32.xlu1 %v992_v18  ;;  %v1153_v19 = vand.u32 65535, %v5052_v40  ;;  %v1808_v16 = vsel %vm4968_vm0, %v1752_v14, 0.0  ;;  %v4056_v18 = vld [vmem:[%s3257_s16 + $0xd0] sm:$0xff] }
 0x25c   : > { %v4044_v48 = vpop.xlane.xlu0 %1003  ;;  %v4046_v56 = vpop.xlane.xlu1 %1129  ;;  %v1753_v3 = vmul.f32 %v4056_v18, %v4056_v18  ;;  %v5056_v14 = vld [vmem:[#allocation42_spill] sm:$0xff] }
 0x25d   : > { %vm1005_vm10 = vcmp.eq.f32.partialorder %v3723_v51, %v4044_v48  ;;  %vm1131_vm11 = vcmp.eq.f32.partialorder %v3716_v10, %v4046_v56  ;;  %v1029_v51 = vcvt.s32.f32 %v1027_v62  ;;  %v1155_v40 = vcvt.s32.f32 %v1153_v19 }
 0x25e   : > { %v1006_v27 = vsel %vm1005_vm10, %v1001_v0, inf  ;;  %v1132_v24 = vsel %vm1131_vm11, %v1127_v49, inf  ;;  %v1167_v10 = vand.u32 65535, %v3728_v44  ;;  %v5054_v0 = vld [vmem:[#allocation41_spill] sm:$0xff]  ;;  %v1041_v62 = vand.u32 65535, %v3742_v53 }
 0x25f   : > { %1007 = vmin.xlane.f32.xlu0 %v1006_v27  ;;  %1133 = vmin.xlane.f32.xlu1 %v1132_v24  ;;  %v1013_v21 = vand.u32 65535, %v5054_v0  ;;  %v4071_v27 = vld [vmem:[%s3257_s16 + $0xd8] sm:$0xff]  ;;  %v1809_v44 = vadd.f32 %v1808_v16, %v1807_v2  ;;  %v1181_v16 = vand.u32 65535, %v3767_v33  ;;  %v5057_v33 = vld [vmem:[#allocation45_spill] sm:$0xff] }
 0x260   : > { %v4060_v42 = vpop.xlane.xlu0 %1031  ;;  %v4062_v63 = vpop.xlane.xlu1 %1157  ;;  %v1754_v24 = vmul.f32 %v4071_v27, %v4071_v27  ;;  %v1043_v2 = vcvt.s32.f32 %v1041_v62 }
 0x261   : > { %5053 = vst [vmem:[#allocation21_spill] sm:$0xff] %v4060_v42  ;;  %vm1033_vm12 = vcmp.eq.f32.partialorder %v5055_v4, %v4060_v42  ;;  %vm1159_vm13 = vcmp.eq.f32.partialorder %v5056_v14, %v4062_v63  ;;  %v1169_v4 = vcvt.s32.f32 %v1167_v10  ;;  %v1015_v42 = vcvt.s32.f32 %v1013_v21 }
 0x262   : > { %v1034_v49 = vsel %vm1033_vm12, %v1029_v51, inf  ;;  %v1160_v52 = vsel %vm1159_vm13, %v1155_v40, inf  ;;  %v1195_v51 = vand.u32 65535, %v3749_v39  ;;  %v1810_v40 = vsel %vm4968_vm0, %v1753_v3, 0.0 }
 0x263   : > { %1035 = vmin.xlane.f32.xlu0 %v1034_v49  ;;  %1161 = vmin.xlane.f32.xlu1 %v1160_v52  ;;  %v1811_v10 = vadd.f32 %v1810_v40, %v1809_v44  ;;  %v1223_v3 = vand.u32 65535, %v3770_v45  ;;  %v4093_v49 = vld [vmem:[%s3257_s16 + $0xe0] sm:$0xff]  ;;  %v1183_v44 = vcvt.s32.f32 %v1181_v16  ;;  %v1209_v45 = vand.u32 65535, %v3791_v5 }
 0x264   : > { %v4076_v19 = vpop.xlane.xlu0 %1171  ;;  %v4078_v0 = vpop.xlane.xlu1 %1017  ;;  %v1197_v39 = vcvt.s32.f32 %v1195_v51 }
 0x265   : > { %vm1173_vm14 = vcmp.eq.f32.partialorder %v3761_v34, %v4076_v19  ;;  %vm1019_vm15 = vcmp.eq.f32.partialorder %v3763_v57, %v4078_v0  ;;  %v1755_v34 = vmul.f32 %v4093_v49, %v4093_v49  ;;  %v1812_v57 = vsel %vm4968_vm0, %v1754_v24, 0.0 }
 0x266   : > { %v1174_v52 = vsel %vm1173_vm14, %v1169_v4, inf  ;;  %v1020_v53 = vsel %vm1019_vm15, %v1015_v42, inf  ;;  %v1813_v4 = vadd.f32 %v1812_v57, %v1811_v10  ;;  %v1251_v24 = vand.u32 65535, %v3794_v20 }
 0x267   : > { %1175 = vmin.xlane.f32.xlu0 %v1174_v52  ;;  %1021 = vmin.xlane.f32.xlu1 %v1020_v53  ;;  %v1225_v52 = vcvt.s32.f32 %v1223_v3  ;;  %v1211_v10 = vcvt.s32.f32 %v1209_v45 }
 0x268   : > { %v4087_v21 = vpop.xlane.xlu0 %1199  ;;  %v4089_v14 = vpop.xlane.xlu1 %1045  ;;  %v1253_v57 = vcvt.s32.f32 %v1251_v24 }
 0x269   : > { %vm1201_vm1 = vcmp.eq.f32.partialorder %v3786_v43, %v4087_v21  ;;  %vm1047_vm2 = vcmp.eq.f32.partialorder %v5057_v33, %v4089_v14  ;;  %v4109_v43 = vld [vmem:[%s3257_s16 + $0xe8] sm:$0xff]  ;;  %v4124_v33 = vld [vmem:[%s3257_s16 + $0xf0] sm:$0xff] }
 0x26a   : > { %v1202_v42 = vsel %vm1201_vm1, %v1197_v39, inf  ;;  %v1048_v62 = vsel %vm1047_vm2, %v1043_v2, inf  ;;  %v1756_v53 = vmul.f32 %v4109_v43, %v4109_v43  ;;  %v1814_v2 = vsel %vm4968_vm0, %v1755_v34, 0.0 }
 0x26b   : > { %1203 = vmin.xlane.f32.xlu0 %v1202_v42  ;;  %1049 = vmin.xlane.f32.xlu1 %v1048_v62  ;;  %v1815_v20 = vadd.f32 %v1814_v2, %v1813_v4  ;;  %v1237_v34 = vand.u32 65535, %v3811_v46  ;;  %v1265_v4 = vand.u32 65535, %v3826_v15 }
 0x26c   : > { %v4103_v51 = vpop.xlane.xlu0 %1227  ;;  %v4105_v40 = vpop.xlane.xlu1 %1185 }
 0x26d   : > { %vm1229_vm4 = vcmp.eq.f32.partialorder %v3804_v31, %v4103_v51  ;;  %vm1187_vm5 = vcmp.eq.f32.partialorder %v3806_v35, %v4105_v40  ;;  %v1757_v31 = vmul.f32 %v4124_v33, %v4124_v33  ;;  %v1816_v35 = vsel %vm4968_vm0, %v1756_v53, 0.0 }
 0x26e   : > { %v1230_v5 = vsel %vm1229_vm4, %v1225_v52, inf  ;;  %v1188_v16 = vsel %vm1187_vm5, %v1183_v44, inf  ;;  %v1817_v44 = vadd.f32 %v1816_v35, %v1815_v20  ;;  %v1239_v46 = vcvt.s32.f32 %v1237_v34  ;;  %v4137_v52 = vld [vmem:[%s3257_s16 + $0xf8] sm:$0xff]  ;;  %v2963_v35 = vld [vmem:[%s3257_s16] sm:$0xff] }
 0x26f   : > { %1231 = vmin.xlane.f32.xlu0 %v1230_v5  ;;  %1189 = vmin.xlane.f32.xlu1 %v1188_v16  ;;  %v1758_v24 = vmul.f32 %v4137_v52, %v4137_v52  ;;  %v1267_v5 = vcvt.s32.f32 %v1265_v4  ;;  %v5058_v20 = vld [vmem:[#allocation44_spill] sm:$0xff]  ;;  %v1893_v34 = vsel %vm1831_vm3, %v3802_v54, 0.0  ;;  %v1375_v4 = vcvt.s32.f32 %v3507_v50 }
 0x270   : > { %v4118_v39 = vpop.xlane.xlu0 %1255  ;;  %v4120_v3 = vpop.xlane.xlu1 %1213  ;;  %vm377_vm4 = vcmask 0  }
 0x271   : > { %vm1257_vm6 = vcmp.eq.f32.partialorder %v3820_v47, %v4118_v39  ;;  %vm1215_vm7 = vcmp.eq.f32.partialorder %v3822_v58, %v4120_v3  ;;  %v1818_v47 = vsel %vm4968_vm0, %v1757_v31, 0.0  ;;  %v1820_v15 = vsel %vm4968_vm0, %v1758_v24, 0.0  ;;  %v2968_v24 = vld [vmem:[%s3257_s16 + $0x90] sm:$0xff]  ;;  %2570 = vmatprep.mubr.f32.mxu1 %v1375_v4 }
 0x272   : > { %v1258_v42 = vsel %vm1257_vm6, %v1253_v57, inf  ;;  %v1216_v62 = vsel %vm1215_vm7, %v1211_v10, inf  ;;  %v1819_v53 = vadd.f32 %v1818_v47, %v1817_v44  ;;  %v2966_v44 = vld [vmem:[%s3257_s16 + $0x88] sm:$0xff]  ;;  %v2969_v47 = vld [vmem:[%s3257_s16 + $0x18] sm:$0xff] }
 0x273   : > { %1259 = vmin.xlane.f32.xlu0 %v1258_v42  ;;  %1217 = vmin.xlane.f32.xlu1 %v1216_v62  ;;  %v2965_v62 = vld [vmem:[%s3257_s16 + $0x8] sm:$0xff] }
 0x274   : > { %v4133_v45 = vpop.xlane.xlu1 %1241  ;;  %v1821_v10 = vadd.f32 %v1820_v15, %v1819_v53  ;;  %v2971_v15 = vld [vmem:[%s3257_s16 + $0x20] sm:$0xff] }
 0x275   : > { %vm1243_vm8 = vcmp.eq.f32.partialorder %v3833_v25, %v4133_v45  ;;  %v1891_v25 = vsel %vm1831_vm3, %v5058_v20, 0.0  ;;  %v2973_v20 = vld [vmem:[%s3257_s16 + $0x28] sm:$0xff] }
 0x276   : > { %v1244_v58 = vsel %vm1243_vm8, %v1239_v46, inf  ;;  %v1892_v57 = vadd.f32 %v1891_v25, %v3838_v55  ;;  %v2901_v46 = vpack.i.bf16 %v2965_v62, %v2966_v44  ;;  %v2967_v55 = vld [vmem:[%s3257_s16 + $0x10] sm:$0xff]  ;;  %v2974_v25 = vld [vmem:[%s3257_s16 + $0xa8] sm:$0xff]  ;;  %v884_v62 = vcvt.f32.s32 %v3891_v28 }
 0x277   : > { %1245 = vmin.xlane.f32.xlu1 %v1244_v58  ;;  %v2903_v54 = vpack.i.bf16 %v2967_v55, %v2968_v24  ;;  %v2970_v58 = vld [vmem:[%s3257_s16 + $0x98] sm:$0xff] }
 0x278   : > { %v4144_v2 = vpop.xlane.xlu1 %1269  ;;  %v1894_v31 = vadd.f32 %v1893_v34, %v1892_v57  ;;  %v2905_v53 = vpack.i.bf16 %v2969_v47, %v2970_v58  ;;  %v2909_v57 = vpack.i.bf16 %v2973_v20, %v2974_v25  ;;  %v870_v34 = vcvt.f32.s32 %v3879_v32  ;;  %v2976_v24 = vld [vmem:[%s3257_s16 + $0x38] sm:$0xff]  ;;  %v2977_v20 = vld [vmem:[%s3257_s16 + $0x40] sm:$0xff] }
 0x279   : > { %vm1271_vm9 = vcmp.eq.f32.partialorder %v3840_v60, %v4144_v2  ;;  %v2964_v60 = vld [vmem:[%s3257_s16 + $0x80] sm:$0xff]  ;;  %v2915_v25 = vpack.i.bf16 %v2977_v20, %v4024_v6 }
 0x27a   : > { %v1272_v16 = vsel %vm1271_vm9, %v1267_v5, inf  ;;  %v2899_v42 = vpack.i.bf16 %v2963_v35, %v2964_v60  ;;  %v3125_v5 = vmov 0.0   ;;  %v2975_v35 = vld [vmem:[%s3257_s16 + $0x30] sm:$0xff] }
 0x27b   : > { %1273 = vmin.xlane.f32.xlu1 %v1272_v16  ;;  %379 = vst [vmem:[%s4169_s14] sm:$0x1] %v3125_v5  ;;  %v2972_v16 = vld [vmem:[%s3257_s16 + $0xa0] sm:$0xff]  ;;  %v2911_v60 = vpack.i.bf16 %v2975_v35, %v3992_v59  ;;  %v3126_v35 = vmov 1.0   ;;  %378 = vst.msk [vmem:[%s4265_s23] sm:$0x1] %vm377_vm4, %v3125_v5 }
 0x27f   : > { %1822 = vadd.xlane.f32.xlu1 %v1821_v10  ;;  %v2907_v10 = vpack.i.bf16 %v2971_v15, %v2972_v16  ;;  %v856_v15 = vcvt.f32.s32 %v3904_v12  ;;  %v5074_v12 = vld [vmem:[#allocation21_spill] sm:$0xff] }
 0x283   : > { %1895 = vadd.xlane.f32.xlu1 %v1894_v31 }
 0x2a0   : > { %2900 = vxpose.xlu0.b32.start [1/16] (narrow) %v2899_v42, 32  ;;  %v842_v42 = vcvt.f32.s32 %v3888_v9 }
 0x2a2   : > { %v843_v47 = vshll.u32 %v842_v42, 16  ;;  %v2978_v42 = vld [vmem:[%s3257_s16 + $0x48] sm:$0xff] }
 0x2a4   : > { %2902 = vxpose.xlu0.b32.cont [2/16] (narrow) %v2901_v46, 32  ;;  %v871_v46 = vshll.u32 %v870_v34, 16 }
 0x2a8   : > { %2904 = vxpose.xlu0.b32.cont [3/16] (narrow) %v2903_v54, 32  ;;  %v2913_v54 = vpack.i.bf16 %v2976_v24, %v4007_v23  ;;  %v857_v23 = vshll.u32 %v856_v15, 16 }
 0x2ac   : > { %2906 = vxpose.xlu0.b32.cont [4/16] (narrow) %v2905_v53, 32  ;;  %v885_v53 = vshll.u32 %v884_v62, 16  ;;  %v2917_v62 = vpack.i.bf16 %v2978_v42, %v4039_v1 }
 0x2b0   : > { %2908 = vxpose.xlu0.b32.cont [5/16] (narrow) %v2907_v10, 32 }
 0x2b4   : > { %2910 = vxpose.xlu0.b32.cont [6/16] (narrow) %v2909_v57, 32  ;;  %v868_v31 = vpop.xlane.xlu0 %867  ;;  %v898_v57 = vcvt.f32.s32 %v3913_v17  ;;  %v926_v17 = vcvt.f32.s32 %v3901_v36 }
 0x2b5   : > { %v869_v44 = vcvt.f32.s32 %v868_v31 }
 0x2b7   : > { %v872_v16 = vadd.s32 %v871_v46, %v869_v44  ;;  %v899_v44 = vshll.u32 %v898_v57, 16  ;;  %v912_v46 = vcvt.f32.s32 %v3931_v30  ;;  %v927_v30 = vshll.u32 %v926_v17, 16 }
 0x2b8   : > { %2912 = vxpose.xlu0.b32.cont [7/16] (narrow) %v2911_v60, 32  ;;  %v840_v55 = vpop.xlane.xlu0 %839 }
 0x2b9   : > { %v841_v58 = vcvt.f32.s32 %v840_v55  ;;  %v882_v32 = vpop.xlane.xlu1 %881  ;;  %vm1281_vm10 = vcmp.eq.s32.totalorder %v3507_v50, %v872_v16  ;;  %v913_v15 = vshll.u32 %v912_v46, 16  ;;  %v2980_v16 = vld [vmem:[%s3257_s16 + $0x58] sm:$0xff]  ;;  %v2982_v46 = vld [vmem:[%s3257_s16 + $0x68] sm:$0xff] }
 0x2ba   : > { %v883_v59 = vcvt.f32.s32 %v882_v32  ;;  %v2979_v32 = vld [vmem:[%s3257_s16 + $0x50] sm:$0xff] }
 0x2bb   : > { %v844_v10 = vadd.s32 %v843_v47, %v841_v58 }
 0x2bc   : > { %v886_v9 = vadd.s32 %v885_v53, %v883_v59  ;;  %2914 = vxpose.xlu0.b32.cont [8/16] (narrow) %v2913_v54, 32  ;;  %v924_v28 = vpop.xlane.xlu0 %923  ;;  %v2919_v53 = vpack.i.bf16 %v2979_v32, %v4056_v18  ;;  %v2383_v59 = vsel %vm1281_vm10, 1.0, %v3125_v5 }
 0x2bd   : > { %v854_v34 = vpop.xlane.xlu1 %853  ;;  %vm1279_vm3 = vcmp.eq.s32.totalorder %v3507_v50, %v844_v10  ;;  %v925_v24 = vcvt.f32.s32 %v924_v28 }
 0x2be   : > { %v855_v31 = vcvt.f32.s32 %v854_v34  ;;  %2696 = vmatprep.mubr.msk.f32.mxu0 %vm1279_vm3, %v3126_v35  ;;  %vm1282_vm11 = vcmp.eq.s32.totalorder %v3507_v50, %v886_v9  ;;  %v2381_v54 = vsel %vm1279_vm3, 1.0, %v3125_v5 }
 0x2bf   : > { %vm4198_vm12 = vmpackc.low %vm1282_vm11, %vm1281_vm10  ;;  %v4226_v28 = vadd.s32 %v927_v30, %v925_v24  ;;  %v2384_v57 = vsel %vm1282_vm11, 1.0, %v3125_v5  ;;  %v1108_v24 = vcvt.f32.s32 %v3964_v11  ;;  %v1080_v11 = vcvt.f32.s32 %v3982_v7 }
 0x2c0   : > { %v858_v6 = vadd.s32 %v857_v23, %v855_v31  ;;  %2916 = vxpose.xlu0.b32.cont [9/16] (narrow) %v2915_v25, 32  ;;  %v896_v60 = vpop.xlane.xlu0 %895  ;;  %v2921_v23 = vpack.i.bf16 %v2980_v16, %v4071_v27 }
 0x2c1   : > { %v897_v55 = vcvt.f32.s32 %v896_v60  ;;  %vm1285_vm2 = vcmp.eq.s32.totalorder %v3507_v50, %v4226_v28  ;;  %v2981_v60 = vld [vmem:[%s3257_s16 + $0x60] sm:$0xff] }
 0x2c2   : > { %vm1280_vm13 = vcmp.eq.s32.totalorder %v3507_v50, %v858_v6  ;;  %v2923_v42 = vpack.i.bf16 %v2981_v60, %v4093_v49  ;;  %v2925_v49 = vpack.i.bf16 %v2982_v46, %v4109_v43  ;;  %v968_v60 = vcvt.f32.s32 %v4014_v61 }
 0x2c3   : > { %v900_v47 = vadd.s32 %v899_v44, %v897_v55  ;;  %v2382_v36 = vsel %vm1280_vm13, 1.0, %v3125_v5  ;;  %2697 = vmatmul.mubr.msk.f32.vlgmr.msra.gmra.mrb[0].mxu0 %vm1280_vm13, %v3126_v35  ;;  %vm4214_vm14 = vmpackc.low %vm1280_vm13, %vm1279_vm3  ;;  %v1094_v55 = vcvt.f32.s32 %v3959_v22  ;;  %v3127_v61 = vmov 1.0|1.0  }
 0x2c4   : > { %v1910_v58 = vadd.f32 %v2382_v36, %v2381_v54  ;;  %2918 = vxpose.xlu0.b32.cont [10/16] (narrow) %v2917_v62, 32  ;;  %2699 = vmatprep.mubr.msk.f32.mxu0 %vm1281_vm10, %v3126_v35  ;;  %v2387_v62 = vsel %vm1285_vm2, 1.0, %v3125_v5 }
 0x2c5   : > { %v910_v10 = vpop.xlane.xlu1 %909  ;;  %vm1283_vm15 = vcmp.eq.s32.totalorder %v3507_v50, %v900_v47  ;;  %v2983_v47 = vld [vmem:[%s3257_s16 + $0x70] sm:$0xff]  ;;  %v1095_v30 = vshll.u32 %v1094_v55, 16 }
 0x2c6   : > { %v1911_v20 = vadd.f32 %v2383_v59, %v1910_v58  ;;  %v911_v25 = vcvt.f32.s32 %v910_v10  ;;  %v2385_v31 = vsel %vm1283_vm15, 1.0, %v3125_v5  ;;  %v2927_v36 = vpack.i.bf16 %v2983_v47, %v4124_v33 }
 0x2c7   : > { %2700 = vmatmul.mubr.msk.f32.gmra.mrb[2].mxu0 %vm1282_vm11, %v3126_v35 }
 0x2c8   : > { %v914_v18 = vadd.s32 %v913_v15, %v911_v25  ;;  %v1912_v34 = vadd.f32 %v2384_v57, %v1911_v20  ;;  %2920 = vxpose.xlu0.b32.cont [11/16] (narrow) %v2919_v53, 32  ;;  %2702 = vmatprep.mubr.msk.f32.mxu0 %vm1283_vm15, %v3126_v35  ;;  %v1109_v53 = vshll.u32 %v1108_v24, 16  ;;  %v1066_v15 = vcvt.f32.s32 %v3971_v13  ;;  %v2984_v20 = vld [vmem:[%s3257_s16 + $0x78] sm:$0xff] }
 0x2c9   : > { %v2929_v22 = vpack.i.bf16 %v2984_v20, %v4137_v52  ;;  %v940_v13 = vcvt.f32.s32 %v3998_v29 }
 0x2ca   : > { %v1913_v17 = vadd.f32 %v2385_v31, %v1912_v34  ;;  %vm1284_vm1 = vcmp.eq.s32.totalorder %v3507_v50, %v914_v18  ;;  %v1067_v33 = vshll.u32 %v1066_v15, 16  ;;  %v954_v18 = vcvt.f32.s32 %v3980_v41 }
 0x2cb   : > { %v2386_v9 = vsel %vm1284_vm1, 1.0, %v3125_v5  ;;  %2703 = vmatmul.mubr.msk.f32.gmra.mrb[4].mxu0 %vm1284_vm1, %v3126_v35  ;;  %vm4252_vm5 = vmpackc.low %vm1284_vm1, %vm1283_vm15  ;;  %v1081_v41 = vshll.u32 %v1080_v11, 16  ;;  %v1010_v15 = vcvt.f32.s32 %v4044_v48 }
 0x2cc   : > { %v1914_v6 = vadd.f32 %v2386_v9, %v1913_v17  ;;  %2922 = vxpose.xlu0.b32.cont [12/16] (narrow) %v2921_v23, 32  ;;  %2705 = vmatprep.mubr.msk.f32.mxu0 %vm1285_vm2, %v3126_v35  ;;  %v955_v17 = vshll.u32 %v954_v18, 16  ;;  %v982_v9 = vcvt.f32.s32 %v3996_v37 }
 0x2ce   : > { %v4274_v44 = vadd.f32 %v2387_v62, %v1914_v6  ;;  %v941_v6 = vshll.u32 %v940_v13, 16  ;;  %v983_v24 = vshll.u32 %v982_v9, 16  ;;  %v1164_v13 = vcvt.f32.s32 %v4062_v63 }
 0x2d0   : > { %2924 = vxpose.xlu0.b32.cont [13/16] (narrow) %v2923_v42, 32 }
 0x2d4   : > { %2926 = vxpose.xlu0.b32.cont [14/16] (narrow) %v2925_v49, 32  ;;  %v1092_v54 = vpop.xlane.xlu0 %1091 }
 0x2d5   : > { %v1093_v58 = vcvt.f32.s32 %v1092_v54  ;;  %v969_v54 = vshll.u32 %v968_v60, 16 }
 0x2d6   : > { %v1106_v32 = vpop.xlane.xlu1 %1105 }
 0x2d7   : > { %v4283_v59 = vadd.s32 %v1095_v30, %v1093_v58  ;;  %v1107_v10 = vcvt.f32.s32 %v1106_v32  ;;  %v996_v30 = vcvt.f32.s32 %v4030_v8  ;;  %v1122_v32 = vcvt.f32.s32 %v4028_v38 }
 0x2d8   : > { %2928 = vxpose.xlu0.b32.cont [15/16] (narrow) %v2927_v36, 32  ;;  %v1064_v43 = vpop.xlane.xlu0 %1063  ;;  %v1136_v38 = vcvt.f32.s32 %v4046_v56  ;;  %v1011_v56 = vshll.u32 %v1010_v15, 16 }
 0x2d9   : > { %v4288_v25 = vadd.s32 %v1109_v53, %v1107_v10  ;;  %v1065_v57 = vcvt.f32.s32 %v1064_v43  ;;  %vm1297_vm6 = vcmp.eq.s32.totalorder %v3507_v50, %v4283_v59  ;;  %v997_v48 = vshll.u32 %v996_v30, 16 }
 0x2da   : > { %v1123_v18 = vshll.u32 %v1122_v32, 16 }
 0x2db   : > { %vm1298_vm7 = vcmp.eq.s32.totalorder %v3507_v50, %v4288_v25  ;;  %v4306_v52 = vadd.s32 %v1067_v33, %v1065_v57  ;;  %v1150_v33 = vcvt.f32.s32 %v4012_v26  ;;  %v1137_v26 = vshll.u32 %v1136_v38, 16 }
 0x2dc   : > { %2930 = vxpose.xlu0.b32.end [16/16] (narrow) %v2929_v22, 32  ;;  %v952_v34 = vpop.xlane.xlu0 %951  ;;  %v1078_v16 = vpop.xlane.xlu1 %1077  ;;  %vm4302_vm8 = vmpackc.low %vm1298_vm7, %vm1297_vm6 }
 0x2dd   : > { %v953_v23 = vcvt.f32.s32 %v952_v34  ;;  %v1079_v31 = vcvt.f32.s32 %v1078_v16  ;;  %vm1295_vm9 = vcmp.eq.s32.totalorder %v3507_v50, %v4306_v52  ;;  %v1262_v52 = vcvt.f32.s32 %v4118_v39 }
 0x2de   : > { %v2399_v39 = vsel %vm1297_vm6, 1.0, %v3125_v5 }
 0x2df   : > { %v4308_v29 = vadd.s32 %v1081_v41, %v1079_v31  ;;  %v956_v46 = vadd.s32 %v955_v17, %v953_v23 }
 0x2e0   : > { %v980_v42 = vpop.xlane.xlu0 %979  ;;  %v938_v62 = vpop.xlane.xlu1 %937 }
 0x2e1   : > { %vm1296_vm3 = vcmp.eq.s32.totalorder %v3507_v50, %v4308_v29  ;;  %v939_v49 = vcvt.f32.s32 %v938_v62  ;;  %v981_v55 = vcvt.f32.s32 %v980_v42  ;;  %vm1287_vm13 = vcmp.eq.s32.totalorder %v3507_v50, %v956_v46 }
 0x2e2   : > { %vm2744_vm10 = vmpackc.low %vm1296_vm3, %vm1295_vm9  ;;  %v2389_v20 = vsel %vm1287_vm13, 1.0, %v3125_v5  ;;  %v1151_v42 = vshll.u32 %v1150_v33, 16 }
 0x2e3   : > { %v942_v37 = vadd.s32 %v941_v6, %v939_v49  ;;  %2745 = vmatprep.subr.msk.bf16.mxu1 %vm2744_vm10, %v3127_v61  ;;  %2785 = vmatprep.subr.msk.bf16.mxu0 %vm2744_vm10, %v3127_v61  ;;  %v984_v1 = vadd.s32 %v983_v24, %v981_v55  ;;  %v1038_v55 = vcvt.f32.s32 %v5074_v12  ;;  %v1234_v12 = vcvt.f32.s32 %v4103_v51 }
 0x2e4   : > { %v1148_v47 = vpop.xlane.xlu0 %1147  ;;  %2747 = vmatpush3.bf16.xpose.msk.msra.mxu1 %vm4214_vm14, %v3127_v61  ;;  %2787 = vmatpush3.bf16.msk.msra.mxu0 %vm4214_vm14, %v3127_v61  ;;  %v966_v36 = vpop.xlane.xlu1 %965  ;;  %v2397_v51 = vsel %vm1295_vm9, 1.0, %v3125_v5 }
 0x2e5   : > { %v967_v58 = vcvt.f32.s32 %v966_v36  ;;  %2749 = vmatprep.subr.msk.bf16.mxu1 %vm4302_vm8, %v3127_v61  ;;  %2789 = vmatprep.subr.msk.bf16.mxu0 %vm4302_vm8, %v3127_v61  ;;  %vm1286_vm11 = vcmp.eq.s32.totalorder %v3507_v50, %v942_v37  ;;  %vm1289_vm1 = vcmp.eq.s32.totalorder %v3507_v50, %v984_v1  ;;  %v1149_v41 = vcvt.f32.s32 %v1148_v47 }
 0x2e6   : > { %v2388_v53 = vsel %vm1286_vm11, 1.0, %v3125_v5  ;;  %2706 = vmatmul.mubr.msk.f32.gmra.mrb[6].mxu0 %vm1286_vm11, %v3126_v35  ;;  %vm4345_vm14 = vmpackc.low %vm1286_vm11, %vm1285_vm2  ;;  %v2391_v9 = vsel %vm1289_vm1, 1.0, %v3125_v5  ;;  %v1165_v37 = vshll.u32 %v1164_v13, 16  ;;  %v1024_v47 = vcvt.f32.s32 %v4078_v0 }
 0x2e7   : > { %v970_v10 = vadd.s32 %v969_v54, %v967_v58  ;;  %v1916_v43 = vadd.f32 %v2388_v53, %v4274_v44  ;;  %2708 = vmatprep.mubr.msk.f32.mxu0 %vm1287_vm13, %v3126_v35  ;;  %v4397_v36 = vadd.s32 %v1151_v42, %v1149_v41  ;;  %v1039_v0 = vshll.u32 %v1038_v55, 16 }
 0x2e8   : > { %v1120_v28 = vpop.xlane.xlu0 %1119  ;;  %2791 = vmatpush3.bf16.msk.msra.mxu0 %vm4198_vm12, %v3127_v61  ;;  %v994_v22 = vpop.xlane.xlu1 %993  ;;  %v1025_v38 = vshll.u32 %v1024_v47, 16 }
 0x2e9   : > { %v1917_v11 = vadd.f32 %v2389_v20, %v1916_v43  ;;  %v1121_v57 = vcvt.f32.s32 %v1120_v28  ;;  %v995_v44 = vcvt.f32.s32 %v994_v22  ;;  %vm1288_vm15 = vcmp.eq.s32.totalorder %v3507_v50, %v970_v10 }
 0x2ea   : > { %v2390_v16 = vsel %vm1288_vm15, 1.0, %v3125_v5  ;;  %2709 = vmatmul.mubr.msk.f32.gmra.mrb[8].mxu0 %vm1288_vm15, %v3126_v35  ;;  %vm4369_vm2 = vmpackc.low %vm1288_vm15, %vm1287_vm13  ;;  %v1052_v20 = vcvt.f32.s32 %v4089_v14  ;;  %v1178_v14 = vcvt.f32.s32 %v4076_v19  ;;  %v1206_v19 = vcvt.f32.s32 %v4087_v21 }
 0x2eb   : > { %v998_v34 = vadd.s32 %v997_v48, %v995_v44  ;;  %v4373_v23 = vadd.s32 %v1123_v18, %v1121_v57  ;;  %v1918_v31 = vadd.f32 %v2390_v16, %v1917_v11  ;;  %2711 = vmatprep.mubr.msk.f32.mxu0 %vm1289_vm1, %v3126_v35  ;;  %v1192_v44 = vcvt.f32.s32 %v4105_v40 }
 0x2ec   : > { %v1008_v63 = vpop.xlane.xlu0 %1007  ;;  %2751 = vmatpush3.bf16.xpose.msk.msra.mxu1 %vm4198_vm12, %v3127_v61  ;;  %v1134_v17 = vpop.xlane.xlu1 %1133  ;;  %v1053_v57 = vshll.u32 %v1052_v20, 16  ;;  %v1179_v16 = vshll.u32 %v1178_v14, 16  ;;  %v1276_v20 = vcvt.f32.s32 %v4144_v2  ;;  %v2400_v14 = vsel %vm1298_vm7, 1.0, %v3125_v5 }
 0x2ed   : > { %v1009_v6 = vcvt.f32.s32 %v1008_v63  ;;  %v1135_v60 = vcvt.f32.s32 %v1134_v17  ;;  %vm1290_vm8 = vcmp.eq.s32.totalorder %v3507_v50, %v998_v34  ;;  %v1919_v62 = vadd.f32 %v2391_v9, %v1918_v31 }
 0x2ee   : > { %v2392_v46 = vsel %vm1290_vm8, 1.0, %v3125_v5  ;;  %vm4388_vm10 = vmpackc.low %vm1290_vm8, %vm1289_vm1  ;;  %2712 = vmatmul.mubr.msk.f32.gmra.mrb[10].mxu0 %vm1290_vm8, %v3126_v35  ;;  %vm1299_vm12 = vcmp.eq.s32.totalorder %v3507_v50, %v4373_v23  ;;  %vm1301_vm1 = vcmp.eq.s32.totalorder %v3507_v50, %v4397_v36  ;;  %v1220_v31 = vcvt.f32.s32 %v4120_v3 }
 0x2ef   : > { %v1012_v24 = vadd.s32 %v1011_v56, %v1009_v6  ;;  %v4393_v54 = vadd.s32 %v1137_v26, %v1135_v60  ;;  %v1920_v30 = vadd.f32 %v2392_v46, %v1919_v62  ;;  %v1193_v6 = vshll.u32 %v1192_v44, 16 }
 0x2f0   : > { %v1036_v58 = vpop.xlane.xlu0 %1035  ;;  %v1162_v32 = vpop.xlane.xlu1 %1161  ;;  %v1207_v46 = vshll.u32 %v1206_v19, 16  ;;  %v1248_v3 = vcvt.f32.s32 %v4133_v45  ;;  %v1277_v7 = vshll.u32 %v1276_v20, 16 }
 0x2f1   : > { %vm1300_vm11 = vcmp.eq.s32.totalorder %v3507_v50, %v4393_v54  ;;  %v1037_v1 = vcvt.f32.s32 %v1036_v58  ;;  %v1163_v53 = vcvt.f32.s32 %v1162_v32  ;;  %vm1291_vm13 = vcmp.eq.s32.totalorder %v3507_v50, %v1012_v24 }
 0x2f2   : > { %v2393_v15 = vsel %vm1291_vm13, 1.0, %v3125_v5  ;;  %2714 = vmatprep.mubr.msk.f32.mxu0 %vm1291_vm13, %v3126_v35  ;;  %vm2752_vm15 = vmpackc.low %vm1300_vm11, %vm1299_vm12  ;;  %v1221_v24 = vshll.u32 %v1220_v31, 16  ;;  %v2402_v23 = vsel %vm1300_vm11, 1.0, %v3125_v5 }
 0x2f3   : > { %v4416_v10 = vadd.s32 %v1165_v37, %v1163_v53  ;;  %v1921_v43 = vadd.f32 %v2393_v15, %v1920_v30  ;;  %2753 = vmatprep.subr.msk.bf16.mxu1 %vm2752_vm15, %v3127_v61  ;;  %2793 = vmatprep.subr.msk.bf16.mxu0 %vm2752_vm15, %v3127_v61  ;;  %v1040_v48 = vadd.s32 %v1039_v0, %v1037_v1  ;;  %v1235_v1 = vshll.u32 %v1234_v12, 16 }
 0x2f4   : > { %v1176_v28 = vpop.xlane.xlu0 %1175  ;;  %2755 = vmatpush3.bf16.xpose.msk.msra.mxu1 %vm4252_vm5, %v3127_v61  ;;  %2795 = vmatpush3.bf16.msk.msra.mxu0 %vm4252_vm5, %v3127_v61  ;;  %v1022_v22 = vpop.xlane.xlu1 %1021  ;;  %v1249_v0 = vshll.u32 %v1248_v3, 16 }
 0x2f5   : > { %vm1302_vm8 = vcmp.eq.s32.totalorder %v3507_v50, %v4416_v10  ;;  %v1023_v11 = vcvt.f32.s32 %v1022_v22  ;;  %v1177_v56 = vcvt.f32.s32 %v1176_v28  ;;  %vm1293_vm0 = vcmp.eq.s32.totalorder %v3507_v50, %v1040_v48 }
 0x2f6   : > { %vm2756_vm15 = vmpackc.low %vm1302_vm8, %vm1301_vm1  ;;  %v2395_v63 = vsel %vm1293_vm0, 1.0, %v3125_v5  ;;  %v2404_v49 = vsel %vm1302_vm8, 1.0, %v3125_v5 }
 0x2f7   : > { %v1026_v27 = vadd.s32 %v1025_v38, %v1023_v11  ;;  %2757 = vmatprep.subr.msk.bf16.mxu1 %vm2756_vm15, %v3127_v61  ;;  %2797 = vmatprep.subr.msk.bf16.mxu0 %vm2756_vm15, %v3127_v61  ;;  %v4465_v60 = vadd.s32 %v1179_v16, %v1177_v56  ;;  %v1263_v11 = vshll.u32 %v1262_v52, 16  ;;  %v2403_v16 = vsel %vm1301_vm1, 1.0, %v3125_v5  ;;  %v5081_v52 = vld [vmem:[#allocation18_spill] sm:$0xff] }
 0x2f8   : > { %v1204_v33 = vpop.xlane.xlu0 %1203  ;;  %2799 = vmatpush3.bf16.msk.msra.mxu0 %vm4345_vm14, %v3127_v61  ;;  %v1050_v18 = vpop.xlane.xlu1 %1049 }
 0x2f9   : > { %v1051_v13 = vcvt.f32.s32 %v1050_v18  ;;  %vm1292_vm5 = vcmp.eq.s32.totalorder %v3507_v50, %v1026_v27  ;;  %v1205_v21 = vcvt.f32.s32 %v1204_v33 }
 0x2fa   : > { %v2394_v34 = vsel %vm1292_vm5, 1.0, %v3125_v5  ;;  %2715 = vmatmul.mubr.msk.f32.gmra.mrb[12].mxu0 %vm1292_vm5, %v3126_v35  ;;  %vm4451_vm15 = vmpackc.low %vm1292_vm5, %vm1291_vm13 }
 0x2fb   : > { %v1054_v26 = vadd.s32 %v1053_v57, %v1051_v13  ;;  %v1922_v41 = vadd.f32 %v2394_v34, %v1921_v43  ;;  %2717 = vmatprep.mubr.msk.f32.mxu0 %vm1293_vm0, %v3126_v35  ;;  %v4484_v47 = vadd.s32 %v1207_v46, %v1205_v21  ;;  %v2398_v43 = vsel %vm1296_vm3, 1.0, %v3125_v5 }
 0x2fc   : > { %v1232_v17 = vpop.xlane.xlu0 %1231  ;;  %2759 = vmatpush3.bf16.xpose.msk.msra.mxu1 %vm4345_vm14, %v3127_v61  ;;  %v1190_v9 = vpop.xlane.xlu1 %1189  ;;  %v2401_v57 = vsel %vm1299_vm12, 1.0, %v3125_v5 }
 0x2fd   : > { %v1923_v42 = vadd.f32 %v2395_v63, %v1922_v41  ;;  %v1191_v62 = vcvt.f32.s32 %v1190_v9  ;;  %vm1294_vm13 = vcmp.eq.s32.totalorder %v3507_v50, %v1054_v26  ;;  %v1233_v58 = vcvt.f32.s32 %v1232_v17 }
 0x2fe   : > { %v2396_v37 = vsel %vm1294_vm13, 1.0, %v3125_v5  ;;  %2718 = vmatmul.mubr.msk.f32.gmra.mrb[14].mxu0 %vm1294_vm13, %v3126_v35  ;;  %vm4476_vm14 = vmpackc.low %vm1294_vm13, %vm1293_vm0  ;;  %vm1303_vm0 = vcmp.eq.s32.totalorder %v3507_v50, %v4465_v60 }
 0x2ff   : > { %v4470_v55 = vadd.s32 %v1193_v6, %v1191_v62  ;;  %v1924_v45 = vadd.f32 %v2396_v37, %v1923_v42  ;;  %2720 = vmatprep.mubr.msk.f32.mxu0 %vm1295_vm9, %v3126_v35  ;;  %vm1305_vm9 = vcmp.eq.s32.totalorder %v3507_v50, %v4484_v47  ;;  %v4524_v22 = vadd.s32 %v1235_v1, %v1233_v58 }
 0x300   : > { %v1218_v30 = vpop.xlane.xlu1 %1217  ;;  %v1260_v15 = vpop.xlane.xlu0 %1259  ;;  %v2405_v63 = vsel %vm1303_vm0, 1.0, %v3125_v5  ;;  %v2407_v46 = vsel %vm1305_vm9, 1.0, %v3125_v5 }
 0x301   : > { %vm1304_vm5 = vcmp.eq.s32.totalorder %v3507_v50, %v4470_v55  ;;  %v1219_v32 = vcvt.f32.s32 %v1218_v30  ;;  %v1925_v53 = vadd.f32 %v2397_v51, %v1924_v45  ;;  %v1261_v2 = vcvt.f32.s32 %v1260_v15 }
 0x302   : > { %vm2760_vm13 = vmpackc.low %vm1304_vm5, %vm1303_vm0  ;;  %2721 = vmatmul.mubr.msk.f32.gmra.mrb[16].mxu0 %vm1296_vm3, %v3126_v35  ;;  %v2406_v6 = vsel %vm1304_vm5, 1.0, %v3125_v5 }
 0x303   : > { %v4505_v38 = vadd.s32 %v1221_v24, %v1219_v32  ;;  %2761 = vmatprep.subr.msk.bf16.mxu1 %vm2760_vm13, %v3127_v61  ;;  %v1926_v28 = vadd.f32 %v2398_v43, %v1925_v53  ;;  %2723 = vmatprep.mubr.msk.f32.mxu0 %vm1297_vm6, %v3126_v35  ;;  %v4562_v25 = vadd.s32 %v1263_v11, %v1261_v2  ;;  %v5082_v2 = vld [vmem:[#allocation9_spill] sm:$0xff] }
 0x304   : > { %2801 = vmatprep.subr.msk.bf16.mxu0 %vm2760_vm13, %v3127_v61  ;;  %v1246_v29 = vpop.xlane.xlu1 %1245  ;;  %2763 = vmatpush3.bf16.xpose.msk.msra.mxu1 %vm4369_vm2, %v3127_v61 }
 0x305   : > { %vm1306_vm3 = vcmp.eq.s32.totalorder %v3507_v50, %v4505_v38  ;;  %2803 = vmatpush3.bf16.msk.msra.mxu0 %vm4369_vm2, %v3127_v61  ;;  %v1247_v48 = vcvt.f32.s32 %v1246_v29  ;;  %v1927_v59 = vadd.f32 %v2399_v39, %v1926_v28  ;;  %vm1309_vm13 = vcmp.eq.s32.totalorder %v3507_v50, %v4562_v25 }
 0x306   : > { %vm2764_vm6 = vmpackc.low %vm1306_vm3, %vm1305_vm9  ;;  %2724 = vmatmul.mubr.msk.f32.gmra.mrb[18].mxu0 %vm1298_vm7, %v3126_v35  ;;  %vm1307_vm7 = vcmp.eq.s32.totalorder %v3507_v50, %v4524_v22  ;;  %v2408_v37 = vsel %vm1306_vm3, 1.0, %v3125_v5  ;;  %v2411_v53 = vsel %vm1309_vm13, 1.0, %v3125_v5 }
 0x307   : > { %v4544_v27 = vadd.s32 %v1249_v0, %v1247_v48  ;;  %2765 = vmatprep.subr.msk.bf16.mxu1 %vm2764_vm6, %v3127_v61  ;;  %v1928_v44 = vadd.f32 %v2400_v14, %v1927_v59  ;;  %2726 = vmatprep.mubr.msk.f32.mxu0 %vm1299_vm12, %v3126_v35  ;;  %v2409_v47 = vsel %vm1307_vm7, 1.0, %v3125_v5 }
 0x308   : > { %2805 = vmatprep.subr.msk.bf16.mxu0 %vm2764_vm6, %v3127_v61  ;;  %v1274_v33 = vpop.xlane.xlu1 %1273 }
 0x309   : > { %vm1308_vm2 = vcmp.eq.s32.totalorder %v3507_v50, %v4544_v27  ;;  %2807 = vmatpush3.bf16.msk.msra.mxu0 %vm4388_vm10, %v3127_v61  ;;  %v1275_v18 = vcvt.f32.s32 %v1274_v33  ;;  %v1929_v56 = vadd.f32 %v2401_v57, %v1928_v44  ;;  %v1909_v27 = vld [vmem:[%s4169_s14] sm:$0x1] }
 0x30a   : > { %vm2768_vm12 = vmpackc.low %vm1308_vm2, %vm1307_vm7  ;;  %2727 = vmatmul.mubr.msk.f32.gmra.mrb[20].mxu0 %vm1300_vm11, %v3126_v35  ;;  %v2410_v58 = vsel %vm1308_vm2, 1.0, %v3125_v5 }
 0x30b   : > { %v4579_v13 = vadd.s32 %v1277_v7, %v1275_v18  ;;  %2809 = vmatprep.subr.msk.bf16.mxu0 %vm2768_vm12, %v3127_v61  ;;  %v1930_v19 = vadd.f32 %v2402_v23, %v1929_v56  ;;  %2729 = vmatprep.mubr.msk.f32.mxu0 %vm1301_vm1, %v3126_v35  ;;  %v1726_v18 = vld [vmem:[%s4265_s23] sm:$0x1] }
 0x30c   : > { %v1823_v34 = vpop.xlane.xlu1 %1822  ;;  %2767 = vmatpush3.bf16.xpose.msk.msra.mxu1 %vm4388_vm10, %v3127_v61 }
 0x30d   : > { %vm1310_vm11 = vcmp.eq.s32.totalorder %v3507_v50, %v4579_v13  ;;  %2811 = vmatpush3.bf16.msk.msra.mxu0 %vm4451_vm15, %v3127_v61  ;;  %v1824_v54 = vrot.slane %v1823_v34, 4  ;;  %v1931_v26 = vadd.f32 %v2403_v16, %v1930_v19  ;;  %2769 = vmatprep.subr.msk.bf16.mxu1 %vm2768_vm12, %v3127_v61 }
 0x30e   : > { %vm4611_vm1 = vmpackc.low %vm1310_vm11, %vm1309_vm13  ;;  %2730 = vmatmul.mubr.msk.f32.gmra.mrb[22].mxu0 %vm1302_vm8, %v3126_v35  ;;  %v2412_v0 = vsel %vm1310_vm11, 1.0, %v3125_v5 }
 0x30f   : > { %v1825_v41 = vadd.f32 %v1824_v54, %v1823_v34  ;;  %2813 = vmatprep.subr.msk.bf16.mxu0 %vm4611_vm1, %v3127_v61  ;;  %v1932_v31 = vadd.f32 %v2404_v49, %v1931_v26  ;;  %2732 = vmatprep.mubr.msk.f32.mxu0 %vm1303_vm0, %v3126_v35 }
 0x310   : > { %v1896_v21 = vpop.xlane.xlu1 %1895 }
 0x311   : > { %v1826_v17 = vrot.slane %v1825_v41, 2  ;;  %2815 = vmatpush3.bf16.msk.msra.mxu0 %vm4476_vm14, %v3127_v61  ;;  %v1897_v10 = vrot.slane %v1896_v21, 4  ;;  %v1933_v9 = vadd.f32 %v2405_v63, %v1932_v31 }
 0x312   : > { %2733 = vmatmul.mubr.msk.f32.gmra.mrb[24].mxu0 %vm1304_vm5, %v3126_v35 }
 0x313   : > { %v1898_v42 = vadd.f32 %v1897_v10, %v1896_v21  ;;  %v1827_v60 = vadd.f32 %v1826_v17, %v1825_v41  ;;  %v1934_v62 = vadd.f32 %v2406_v6, %v1933_v9  ;;  %2735 = vmatprep.mubr.msk.f32.mxu0 %vm1305_vm9, %v3126_v35 }
 0x314   : > { %2771 = vmatpush3.bf16.xpose.msk.msra.mxu1 %vm4451_vm15, %v3127_v61 }
 0x315   : > { %v1899_v12 = vrot.slane %v1898_v42, 2  ;;  %v1828_v3 = vrot.slane %v1827_v60, 1  ;;  %v1935_v55 = vadd.f32 %v2407_v46, %v1934_v62  ;;  %2773 = vmatprep.subr.msk.bf16.mxu1 %vm4611_vm1, %v3127_v61 }
 0x316   : > { %2736 = vmatmul.mubr.msk.f32.gmra.mrb[26].mxu0 %vm1306_vm3, %v3126_v35 }
 0x317   : > { %v1900_v24 = vadd.f32 %v1899_v12, %v1898_v42  ;;  %v1829_v51 = vadd.f32 %v1828_v3, %v1827_v60  ;;  %v1936_v40 = vadd.f32 %v2408_v37, %v1935_v55  ;;  %2738 = vmatprep.mubr.msk.f32.mxu0 %vm1307_vm7, %v3126_v35 }
 0x319   : > { %2824 = vpush %v1829_v51  ;;  %v1901_v45 = vrot.slane %v1900_v24, 1  ;;  %v1937_v30 = vadd.f32 %v2409_v47, %v1936_v40 }
 0x31a   : > { %2739 = vmatmul.mubr.msk.f32.gmra.mrb[28].mxu0 %vm1308_vm2, %v3126_v35 }
 0x31b   : > { %v1902_v32 = vadd.f32 %v1901_v45, %v1900_v24  ;;  %v1938_v1 = vadd.f32 %v2410_v58, %v1937_v30 }
 0x31c   : > { %2775 = vmatpush3.bf16.xpose.msk.msra.mxu1 %vm4476_vm14, %v3127_v61 }
 0x31d   : > { %2826 = vpush %v1902_v32  ;;  %v1939_v15 = vadd.f32 %v2411_v53, %v1938_v1  ;;  %2816 = vmatprep.subr.bf16.mxu1 %v5081_v52 }
 0x31f   : > { %v1940_v43 = vadd.f32 %v2412_v0, %v1939_v15 }
 0x320   : > { %v2931_v38 = vpop.trf.xlu0 }
 0x321   : > { %v2935_v20 = vunpack.i.h.bf16 %v2931_v38  ;;  %v2932_v39 = vunpack.i.l.bf16 %v2931_v38  ;;  %v1941_v28 = vrot.slane %v1940_v43, 4 }
 0x323   : > { %2081 = vmatprep.mubr.f32.mxu0 %v2932_v39  ;;  %v1942_v29 = vadd.f32 %v1941_v28, %v1940_v43  ;;  %2571 = vmatmul.mubr.f32.vlgmr.msra.gmra.mrb[32].mxu1 %v1375_v4 }
 0x324   : > { %v2936_v61 = vpop.trf.xlu0  ;;  %2082 = vmatmul.mubr.f32.vlgmr.msra.gmra.mrb[30].mxu0 %v2935_v20  ;;  %2818 = vmatpush3.bf16.xpose.msra.mxu1 %v5081_v52 }
 0x325   : > { %2741 = vmatprep.mubr.msk.f32.mxu1 %vm1309_vm13, %v3126_v35  ;;  %v2937_v5 = vunpack.i.l.bf16 %v2936_v61  ;;  %v2940_v8 = vunpack.i.h.bf16 %v2936_v61  ;;  %v1943_v22 = vrot.slane %v1942_v29, 2  ;;  %2817 = vmatprep.subr.bf16.mxu1 %v5082_v2 }
 0x327   : > { %2086 = vmatprep.mubr.f32.mxu0 %v2937_v5  ;;  %v1944_v48 = vadd.f32 %v1943_v22, %v1942_v29 }
 0x328   : > { %v2941_v59 = vpop.trf.xlu0  ;;  %2087 = vmatmul.mubr.f32.gmra.mrb[32].mxu0 %v2940_v8 }
 0x329   : > { %v2942_v4 = vunpack.i.l.bf16 %v2941_v59  ;;  %v2945_v11 = vunpack.i.h.bf16 %v2941_v59  ;;  %v1945_v14 = vrot.slane %v1944_v48, 1 }
 0x32b   : > { %2091 = vmatprep.mubr.f32.mxu0 %v2942_v4  ;;  %v1946_v57 = vadd.f32 %v1945_v14, %v1944_v48 }
 0x32c   : > { %v2946_v7 = vpop.trf.xlu0  ;;  %2092 = vmatmul.mubr.f32.gmra.mrb[34].mxu0 %v2945_v11  ;;  %2819 = vmatpush3.bf16.xpose.msra.mxu1 %v5082_v2 }
 0x32d   : > { %v2950_v44 = vunpack.i.h.bf16 %v2946_v7  ;;  %v2947_v33 = vunpack.i.l.bf16 %v2946_v7  ;;  %v1947_v25 = vadd.f32 %v1946_v57, %v1909_v27 }
 0x32f   : > { %2096 = vmatprep.mubr.f32.mxu0 %v2947_v33  ;;  %1948 = vst [vmem:[%s4169_s14] sm:$0x1] %v1947_v25 }
 0x330   : > { %2097 = vmatmul.mubr.f32.gmra.mrb[36].mxu0 %v2950_v44 }
 0x333   : > { %2742 = vmatmul.mubr.msk.f32.vlgmr.msra.gmra.mrb[34].mxu1 %vm1310_vm11, %v3126_v35 }
 0x34a   : > { %s2825_s16 = spop %2824 }
 0x34e   : > { %s2827_s19 = spop %2826 }
 0x34f   : > { %s1904_s20 = ssub.f32 %s2825_s16, %s2827_s19  ;;  %s3128_s16 = smov [#allocation4]  }
 0x351   : > { %v1905_v56 = vstv %s1904_s20 }
 0x352   : > { %v1906_v23 = vadd.f32 %v1905_v56, %v1726_v18 }
 0x354   : > { %1908 = vst.msk [vmem:[%s4265_s23] sm:$0x1] %vm377_vm4, %v1906_v23  ;;  %s2989_s23 = sshll.u32 %s3128_s16, 4  ;;  %s2990_s23 = int_to_ptr.vmem [resolvable:$false] %s2989_s23 }
 0x355   : > { %s2991_s11 = scalar_lea.vmem %s2990_s23, 32  ;;  %p2992_p2 = scmp.lt.s32.totalorder %s2166_s2, %s2990_s23 }
 0x356   : > { %p2993_p3 = scmp.lt.s32.totalorder %s2991_s11, %s2985_s6 }
 0x358   : > { %p2994_p5 = por %p2993_p3, %p2992_p2 }
 0x35a   : > { %p2995_p6 = pnand %p2994_p5, %p2988_p1 }
 0x35c   : > { %2998 = shalt.err (!%p2995_p6)
}
 0x35d   : > { %s2999_s0 = scalar_lea.hbm %s4721_s1, 16  ;;  %s3003_s14 = scalar_lea.hbm %s4922_s7, 32 }
 0x35e   : > { %p3000_p7 = scmp.ne.s32.totalorder %s4721_s1, %s2999_s0  ;;  %p3004_p11 = scmp.lt.u32.totalorder %s4721_s1, %s4922_s7 }
 0x35f   : > { %p3005_p12 = scmp.lt.u32.totalorder %s3003_s14, %s2999_s0  ;;  %p3007_p0 = scmp.lt.u32.totalorder %s2999_s0, %s4721_s1 }
 0x360   : > { %p3001_p9 = pnand %p3000_p7, %p3221_p4 }
 0x361   : > { %p3006_p13 = por %p3005_p12, %p3004_p11 }
 0x362   : > { %p3002_p10 = pneg %p3001_p9 }
 0x363   : > { %p3008_p1 = por %p3007_p0, %p3006_p13 }
 0x365   : > { %p3009_p2 = pnand %p3008_p1, %p3002_p10 }
 0x367   : > { %3012 = shalt.err (!%p3009_p2)
}
 0x368   : > { %2829 = dma.vmem_to_hbm [thread:$0]  (%p3221_p4), %s2166_s2, 16, %s4721_s1, %s2125_s3   ;;  %vm5084_vm4 = vcmask 261120   ;;  %v3129_v45 = vmov 1966171168   ;;  %v5113_v53 = vlaneseq }
 0x369   : > { %s5083_s6 = sshll.u32 %s3249_s24, 3  ;;  %vm5085_vm10 = vmmov %vm5084_vm4  ;;  %v1451_v30 = vunpack.c.l.s4 %v3129_v45  ;;  %s2357_s1 = sshll.u32 %s4164_s26, 5 }
 0x36a   : > { %s4749_s11 = scalar_lea.vmem %s4919_s4, %s5083_s6  ;;  %vm5086_vm8 = vmmov %vm5084_vm4  ;;  %v1454_v15 = vshrl.u32 %v5113_v53, 7  ;;  %s2356_s2 = sshll.u32 %s4164_s26, 1 }
 0x36b   : > { %vm5087_vm15 = vmmov %vm5084_vm4  ;;  %v1452_v1 = vunpack.c.0.s8 %v1451_v30  ;;  %s4814_s24 = scalar_lea.vmem [#allocation6], %s2357_s1  ;;  %s332_s0 = scalar_lea.vmem [#allocation2], %s2356_s2 }
 0x36c   : > { %vm5088_vm14 = vmmov %vm5084_vm4  ;;  %s2149_s12 = sshll.u32 %s332_s0, 4  ;;  %s4823_s19 = scalar_lea.hbm %s4920_s5, %s3242_s21  ;;  %s4825_s12 = int_to_ptr.vmem [resolvable:$true] %s2149_s12 }
 0x36d   : > { %vm5089_vm0 = vmmov %vm5084_vm4  ;;  %v1455_v29 = vsub.s32 %v1452_v1, %v1454_v15  ;;  %s2519_s20 = sshll.u32 %s3115_s30, 9  ;;  %s2178_s6 = sshll.u32 %s4814_s24, 4  ;;  %s4861_s6 = int_to_ptr.vmem [resolvable:$true] %s2178_s6 }
 0x36e   : > { %vm5090_vm5 = vmmov %vm5089_vm0  ;;  %s2117_s16 = scalar_lea.sflag [#allocation3], %s4164_s26  ;;  %s3013_s23 = scalar_lea.vmem %s4825_s12, 32 }
 0x36f   : > { %vm5091_vm9 = vmmov %vm5089_vm0  ;;  %p3014_p3 = scmp.ne.s32.totalorder %s4825_s12, %s3013_s23  ;;  %s3130_s1 = smov [#allocation2]  }
 0x370   : > { %vm5092_vm3 = vmmov %vm5089_vm0  ;;  %s3017_s2 = sshll.u32 %s3130_s1, 4  ;;  %s3018_s2 = int_to_ptr.vmem [resolvable:$false] %s3017_s2 }
 0x371   : > { %vm5093_vm6 = vmmov %vm5089_vm0  ;;  %p3015_p5 = pnand %p3014_p3, %p3221_p4  ;;  %s3019_s21 = scalar_lea.vmem %s3018_s2, 64 }
 0x372   : > { %vm5094_vm7 = vmmov %vm5089_vm0  ;;  %p3020_p7 = scmp.lt.s32.totalorder %s4825_s12, %s3018_s2  ;;  %p3021_p9 = scmp.lt.s32.totalorder %s3019_s21, %s3013_s23 }
 0x373   : > { %vm5095_vm2 = vmmov %vm5089_vm0  ;;  %p3016_p6 = pneg %p3015_p5 }
 0x374   : > { %vm5096_vm12 = vmmov %vm5089_vm0  ;;  %p3022_p10 = por %p3021_p9, %p3020_p7 }
 0x375   : > { %vm5097_vm13 = vmmov %vm5089_vm0 }
 0x376   : > { %vm5098_vm11 = vmmov %vm5089_vm0  ;;  %p3023_p11 = pnand %p3022_p10, %p3016_p6 }
 0x377   : > { %vm5099_vm1 = vmmov %vm5089_vm0 }
 0x396   : > { %v2698_v50 = vpop.f32.mrb[0].mxu0 }
 0x397   : > { %1695 = vst.msk [vmem:[%s4749_s11 + $0x8] sm:$0xff] %vm5084_vm4, %v2698_v50  ;;  %v1535_v35 = vpop.f32.mrb[1].mxu0  ;;  %vm5100_vm4 = vmmov %vm5089_vm0 }
 0x398   : > { %1694 = vst.msk [vmem:[%s4749_s11] sm:$0xff] %vm5085_vm10, %v1535_v35  ;;  %vm5101_vm10 = vmmov %vm5089_vm0 }
 0x39a   : > { %v2701_v13 = vpop.f32.mrb[2].mxu0 }
 0x39b   : > { %1697 = vst.msk [vmem:[%s4749_s11 + $0x18] sm:$0xff] %vm5086_vm8, %v2701_v13  ;;  %v1545_v19 = vpop.f32.mrb[3].mxu0  ;;  %vm5102_vm8 = vmmov %vm5089_vm0 }
 0x39c   : > { %1696 = vst.msk [vmem:[%s4749_s11 + $0x10] sm:$0xff] %vm5087_vm15, %v1545_v19  ;;  %vm5103_vm15 = vmmov %vm5089_vm0 }
 0x39e   : > { %v2704_v34 = vpop.f32.mrb[4].mxu0 }
 0x39f   : > { %1699 = vst.msk [vmem:[%s4749_s11 + $0x28] sm:$0xff] %vm5088_vm14, %v2704_v34  ;;  %v1555_v16 = vpop.f32.mrb[5].mxu0  ;;  %vm5104_vm14 = vmmov %vm5089_vm0 }
 0x3a0   : > { %1698 = vst.msk [vmem:[%s4749_s11 + $0x20] sm:$0xff] %vm5089_vm0, %v1555_v16 }
 0x3b9   : > { %v2707_v54 = vpop.f32.mrb[6].mxu0 }
 0x3ba   : > { %1701 = vst.msk [vmem:[%s4749_s11 + $0x38] sm:$0xff] %vm5090_vm5, %v2707_v54  ;;  %v1565_v26 = vpop.f32.mrb[7].mxu0  ;;  %vm5105_vm5 = vmmov %vm5089_vm0 }
 0x3bb   : > { %1700 = vst.msk [vmem:[%s4749_s11 + $0x30] sm:$0xff] %vm5091_vm9, %v1565_v26  ;;  %vm5106_vm9 = vmmov %vm5089_vm0 }
 0x3bd   : > { %v2710_v36 = vpop.f32.mrb[8].mxu0 }
 0x3be   : > { %1703 = vst.msk [vmem:[%s4749_s11 + $0x48] sm:$0xff] %vm5092_vm3, %v2710_v36  ;;  %v1575_v49 = vpop.f32.mrb[9].mxu0  ;;  %vm5107_vm3 = vmmov %vm5089_vm0 }
 0x3bf   : > { %1702 = vst.msk [vmem:[%s4749_s11 + $0x40] sm:$0xff] %vm5093_vm6, %v1575_v49  ;;  %vm5108_vm6 = vmmov %vm5089_vm0 }
 0x3c1   : > { %v2713_v41 = vpop.f32.mrb[10].mxu0 }
 0x3c2   : > { %1705 = vst.msk [vmem:[%s4749_s11 + $0x58] sm:$0xff] %vm5094_vm7, %v2713_v41  ;;  %v1585_v31 = vpop.f32.mrb[11].mxu0  ;;  %vm5109_vm7 = vmmov %vm5089_vm0 }
 0x3c3   : > { %1704 = vst.msk [vmem:[%s4749_s11 + $0x50] sm:$0xff] %vm5095_vm2, %v1585_v31  ;;  %vm5110_vm2 = vmmov %vm5089_vm0 }
 0x3cd   : > { %v2716_v21 = vpop.f32.mrb[12].mxu0 }
 0x3ce   : > { %1707 = vst.msk [vmem:[%s4749_s11 + $0x68] sm:$0xff] %vm5096_vm12, %v2716_v21  ;;  %v1595_v63 = vpop.f32.mrb[13].mxu0  ;;  %vm5111_vm12 = vmmov %vm5089_vm0 }
 0x3cf   : > { %1706 = vst.msk [vmem:[%s4749_s11 + $0x60] sm:$0xff] %vm5097_vm13, %v1595_v63  ;;  %vm5112_vm13 = vmmov %vm5089_vm0 }
 0x3d1   : > { %v2719_v17 = vpop.f32.mrb[14].mxu0 }
 0x3d2   : > { %1709 = vst.msk [vmem:[%s4749_s11 + $0x78] sm:$0xff] %vm5098_vm11, %v2719_v17  ;;  %v1605_v10 = vpop.f32.mrb[15].mxu0  ;;  %vm1466_vm11 = vcmp.lt.s32.totalorder %v5113_v53, 256 }
 0x3d3   : > { %1708 = vst.msk [vmem:[%s4749_s11 + $0x70] sm:$0xff] %vm5099_vm1, %v1605_v10 }
 0x3d5   : > { %v2722_v9 = vpop.f32.mrb[16].mxu0 }
 0x3d6   : > { %1711 = vst.msk [vmem:[%s4749_s11 + $0x88] sm:$0xff] %vm5100_vm4, %v2722_v9  ;;  %v1615_v6 = vpop.f32.mrb[17].mxu0 }
 0x3d7   : > { %1710 = vst.msk [vmem:[%s4749_s11 + $0x80] sm:$0xff] %vm5101_vm10, %v1615_v6 }
 0x3d9   : > { %v2725_v42 = vpop.f32.mrb[18].mxu0 }
 0x3da   : > { %1713 = vst.msk [vmem:[%s4749_s11 + $0x98] sm:$0xff] %vm5102_vm8, %v2725_v42  ;;  %v1625_v60 = vpop.f32.mrb[19].mxu0 }
 0x3db   : > { %1712 = vst.msk [vmem:[%s4749_s11 + $0x90] sm:$0xff] %vm5103_vm15, %v1625_v60 }
 0x3dd   : > { %v2728_v62 = vpop.f32.mrb[20].mxu0 }
 0x3de   : > { %1715 = vst.msk [vmem:[%s4749_s11 + $0xa8] sm:$0xff] %vm5104_vm14, %v2728_v62  ;;  %v1635_v46 = vpop.f32.mrb[21].mxu0 }
 0x3df   : > { %1714 = vst.msk [vmem:[%s4749_s11 + $0xa0] sm:$0xff] %vm5089_vm0, %v1635_v46 }
 0x3e1   : > { %v2731_v12 = vpop.f32.mrb[22].mxu0 }
 0x3e2   : > { %1717 = vst.msk [vmem:[%s4749_s11 + $0xb8] sm:$0xff] %vm5105_vm5, %v2731_v12  ;;  %v1645_v3 = vpop.f32.mrb[23].mxu0 }
 0x3e3   : > { %1716 = vst.msk [vmem:[%s4749_s11 + $0xb0] sm:$0xff] %vm5106_vm9, %v1645_v3 }
 0x3e5   : > { %v2734_v55 = vpop.f32.mrb[24].mxu0 }
 0x3e6   : > { %1719 = vst.msk [vmem:[%s4749_s11 + $0xc8] sm:$0xff] %vm5107_vm3, %v2734_v55  ;;  %v1655_v37 = vpop.f32.mrb[25].mxu0 }
 0x3e7   : > { %1718 = vst.msk [vmem:[%s4749_s11 + $0xc0] sm:$0xff] %vm5108_vm6, %v1655_v37 }
 0x3e9   : > { %v2737_v24 = vpop.f32.mrb[26].mxu0 }
 0x3ea   : > { %1721 = vst.msk [vmem:[%s4749_s11 + $0xd8] sm:$0xff] %vm5109_vm7, %v2737_v24  ;;  %v1665_v51 = vpop.f32.mrb[27].mxu0 }
 0x3eb   : > { %1720 = vst.msk [vmem:[%s4749_s11 + $0xd0] sm:$0xff] %vm5110_vm2, %v1665_v51 }
 0x3ed   : > { %v2740_v40 = vpop.f32.mrb[28].mxu0 }
 0x3ee   : > { %1723 = vst.msk [vmem:[%s4749_s11 + $0xe8] sm:$0xff] %vm5111_vm12, %v2740_v40  ;;  %v1675_v47 = vpop.f32.mrb[29].mxu0 }
 0x3ef   : > { %1722 = vst.msk [vmem:[%s4749_s11 + $0xe0] sm:$0xff] %vm5112_vm13, %v1675_v47 }
 0x3f6   : > { %v1442_v32 = vpop.f32.mrb[32].mxu1 }
 0x3f7   : > { %v2640_v58 = vpop.f32.mrb[30].mxu0  ;;  %v2820_v52 = vtrunc.f32 %v1442_v32  ;;  %v1444_v43 = vpop.f32.mrb[33].mxu1 }
 0x3f8   : > { %v2641_v0 = vpop.f32.mrb[31].mxu0  ;;  %v2822_v20 = vtrunc.f32 %v1444_v43 }
 0x3f9   : > { %v2642_v38 = vadd.f32 %v2641_v0, %v2640_v58  ;;  %v2821_v39 = vcvt.f32.s32 %v2820_v52 }
 0x3fa   : > { %v2823_v28 = vcvt.f32.s32 %v2822_v20 }
 0x3fb   : > { %v2643_v61 = vpop.f32.mrb[32].mxu0  ;;  %2106 = vst [vmem:[%s4814_s24] sm:$0xff] %v2642_v38 }
 0x3fc   : > { %v2644_v5 = vpop.f32.mrb[33].mxu0  ;;  %v1449_v8 = vcombine.low %v2821_v39, %v2823_v28 }
 0x3fd   : > { %v2645_v22 = vadd.f32 %v2644_v5, %v2643_v61 }
 0x3fe   : > { %v1456_v2 = vrot.slane %v1449_v8, %v1455_v29 }
 0x3ff   : > { %v2646_v48 = vpop.f32.mrb[34].mxu0  ;;  %2107 = vst [vmem:[%s4814_s24 + $0x8] sm:$0xff] %v2645_v22 }
 0x400   : > { %v2647_v59 = vpop.f32.mrb[35].mxu0  ;;  %v1463_v4 = vrot.slane %v1456_v2, %v1455_v29 }
 0x401   : > { %v2648_v11 = vadd.f32 %v2647_v59, %v2646_v48 }
 0x402   : > { %1468 = vst.msk [vmem:[%s332_s0] sm:$0x3] %vm1466_vm11, %v1463_v4 }
 0x403   : > { %v2649_v14 = vpop.f32.mrb[36].mxu0 }
 0x404   : > { %v2650_v27 = vpop.f32.mrb[37].mxu0 }
 0x405   : > { %3026 = shalt.err (!%p3023_p11)
}
 0x406   : > { %s3027_s26 = scalar_lea.hbm %s4823_s19, 32  ;;  %s3031_s14 = scalar_lea.hbm %s4920_s5, 64 }
 0x407   : > { %p3028_p12 = scmp.ne.s32.totalorder %s4823_s19, %s3027_s26  ;;  %p3032_p1 = scmp.lt.u32.totalorder %s4823_s19, %s4920_s5 }
 0x408   : > { %p3033_p2 = scmp.lt.u32.totalorder %s3031_s14, %s3027_s26  ;;  %p3035_p5 = scmp.lt.u32.totalorder %s3027_s26, %s4823_s19 }
 0x409   : > { %p3029_p13 = pnand %p3028_p12, %p3221_p4 }
 0x40a   : > { %p3034_p3 = por %p3033_p2, %p3032_p1 }
 0x40b   : > { %p3030_p0 = pneg %p3029_p13 }
 0x40c   : > { %p3036_p6 = por %p3035_p5, %p3034_p3 }
 0x40e   : > { %p3037_p7 = pnand %p3036_p6, %p3030_p0 }
 0x410   : > { %3040 = shalt.err (!%p3037_p7)
}
 0x411   : > { %2828 = dma.vmem_to_hbm [thread:$0]  (%p3221_p4), %s4825_s12, 32, %s4823_s19, %s2117_s16   ;;  %2108 = vst [vmem:[%s4814_s24 + $0x10] sm:$0xff] %v2648_v11  ;;  %v2651_v7 = vadd.f32 %v2650_v27, %v2649_v14  ;;  %v2743_v57 = vpop.f32.mrb[34].mxu1  ;;  %vm5114_vm1 = vmmov %vm5089_vm0 }
 0x412   : > { %s4857_s26 = scalar_lea.hbm %s4923_s8, %s2519_s20  ;;  %1725 = vst.msk [vmem:[%s4749_s11 + $0xf8] sm:$0xff] %vm5114_vm1, %v2743_v57  ;;  %v1685_v44 = vpop.f32.mrb[35].mxu1  ;;  %vm5115_vm4 = vmmov %vm5089_vm0  ;;  %s3041_s12 = scalar_lea.vmem %s4861_s6, 512 }
 0x413   : > { %2109 = vst [vmem:[%s4814_s24 + $0x18] sm:$0xff] %v2651_v7  ;;  %1724 = vst.msk [vmem:[%s4749_s11 + $0xf0] sm:$0xff] %vm5115_vm4, %v1685_v44  ;;  %p3042_p9 = scmp.ne.s32.totalorder %s4861_s6, %s3041_s12  ;;  %s3131_s30 = smov [#allocation6]  }
 0x414   : > { %s3045_s19 = sshll.u32 %s3131_s30, 4  ;;  %s3046_s19 = int_to_ptr.vmem [resolvable:$false] %s3045_s19 }
 0x415   : > { %p3043_p10 = pnand %p3042_p9, %p3221_p4  ;;  %s3047_s20 = scalar_lea.vmem %s3046_s19, 1024 }
 0x416   : > { %p3048_p12 = scmp.lt.s32.totalorder %s4861_s6, %s3046_s19  ;;  %p3049_p13 = scmp.lt.s32.totalorder %s3047_s20, %s3041_s12 }
 0x417   : > { %p3044_p11 = pneg %p3043_p10 }
 0x418   : > { %p3050_p0 = por %p3049_p13, %p3048_p12 }
 0x41a   : > { %p3051_p1 = pnand %p3050_p0, %p3044_p11 }
 0x41c   : > { %3054 = shalt.err (!%p3051_p1)
}
 0x41d   : > { %s3055_s11 = scalar_lea.hbm %s4857_s26, 512  ;;  %s3059_s0 = scalar_lea.hbm %s4923_s8, 1024 }
 0x41e   : > { %p3056_p2 = scmp.ne.s32.totalorder %s4857_s26, %s3055_s11  ;;  %p3060_p6 = scmp.lt.u32.totalorder %s4857_s26, %s4923_s8 }
 0x41f   : > { %p3061_p7 = scmp.lt.u32.totalorder %s3059_s0, %s3055_s11  ;;  %p3063_p10 = scmp.lt.u32.totalorder %s3055_s11, %s4857_s26 }
 0x420   : > { %p3057_p3 = pnand %p3056_p2, %p3221_p4 }
 0x421   : > { %p3062_p9 = por %p3061_p7, %p3060_p6 }
 0x422   : > { %p3058_p5 = pneg %p3057_p3 }
 0x423   : > { %p3064_p11 = por %p3063_p10, %p3062_p9 }
 0x425   : > { %p3065_p12 = pnand %p3064_p11, %p3058_p5 }
 0x427   : > { %3068 = shalt.err (!%p3065_p12)
}
 0x428   : > { %s3132_s1 = smov 128   ;;  %s3133_s2 = smov 8  }
 0x429   : > { %2830 = dma.vmem_to_hbm [thread:$0]  (%p3221_p4), %s4861_s6, 512, %s4857_s26, %s2125_s3, %s3132_s1, %s3132_s1, %s3133_s2  }
 0x42a PF: > { %p2844_p13 = scmp.ge.s32.totalorder %s3123_s10, 2  ;;  %s2202_s23 = sand.u32 1, %s3103_s27  }
 0x42b   : > { %s2203_s21 = scalar_lea.sflag [#allocation3], %s2202_s23 }
 0x42c   : > { %p2835_p0 = pnand %p2844_p13, %p3230_p8 }
 0x42e   : > { %3094 = dma.done.wait (!%p2835_p0), %s2203_s21, 32  }
 0x42f   : > { %3096 = vsyncadd (!%p2835_p0), %s2203_s21, 4294967264  ;;  %s5116_s12 = sadd.s32 4294967294, %s3123_s10  }
 0x430   : > { %s2217_s30 = sand.u32 1, %s5116_s12  }
 0x431   : > { %s2218_s19 = scalar_lea.sflag [#allocation5], %s2217_s30 }
 0x432   : > { %3098 = dma.done.wait (!%p2835_p0), %s2218_s19, 528  }
 0x433   : > { %3100 = vsyncadd (!%p2835_p0), %s2218_s19, 4294966768  ;;  %s25_s10 = sadd.s32 1, %s3123_s10   ;;  %s5117_s27 = smov %s3107_s28 }
 0x434   : > { %p22_p4 = scmp.ge.s32.totalorder %s25_s10, 4   ;;  %s5118_s28 = smov %s3111_s29 }
 0x435   : > { %s5119_s29 = smov %s3236_s18  ;;  %s5120_s30 = smov %s3119_s9 }
 0x436   : > { %s5121_s9 = smov %s5123_s13  ;;  %24 = sbr.rel (!%p22_p4) target bundleno = 12 (0xc), region = 131 }
 0x43d   :  { %2231 = vsyncpa [#allocation3], 1 }
 0x43e   :  { %2233 = vsyncpa [#allocation3 + $0x1], 1 }
 0x43f   :  { %2234 = vsyncpa [#allocation5], 1 }
 0x440   :  { %2236 = vsyncpa [#allocation5 + $0x1], 1 }

</bundles_post_ra>
